<compile_context>
chip_gen: v7x
topology: tpu7x:2x2x1
jax: 0.10.0
libtpu: 0.0.40
codegen_flags: <defaults>
</compile_context>

<pallas_src>
import jax
import jax.numpy as jnp
import numpy as np
from jax.experimental import pallas as pl
from jax.experimental.pallas import tpu as pltpu


def _gru_decoder_kernel(gi0_ref, h0_ref, wih_ref, whh_ref, gib_ref, bhn_ref,
                        wout_ref, bout_ref, out_ref, seq_ref):
    # gi0_ref : (T*B, 3H)  layer-0 input gates, biases already folded in
    # h0_ref  : (L, B, H)  initial hidden state per layer
    # wih_ref : (L, H, 3H) input->gate weights (slot 0 unused)
    # whh_ref : (L, H, 3H) hidden->gate weights
    # gib_ref : (L, 1, 3H) fused GI bias (b_ih_r+b_hh_r, b_ih_z+b_hh_z, b_ih_n)
    # bhn_ref : (L, 1, H)  b_hh_n (must stay inside r * (...))
    # wout_ref: (H, O_pad) lane-dense (zero-padded) output projection
    # bout_ref: (1, O_pad)
    # out_ref : (T*B, O_pad)
    # seq_ref : (T*B, H)   scratch holding the current layer's hidden outputs
    TB = gi0_ref.shape[0]
    L, B, H = h0_ref.shape
    T = TB // B
    H2 = 2 * H

    for l in range(L):                      # static unroll over GRU layers
        if l == 0:
            # layer-0 input gates precomputed in the wrapper (input width is 1)
            gi_all = gi0_ref[...]                                        # (T*B, 3H)
        else:
            # hoisted input-gate matmul for the whole sequence: off the serial path
            gi_all = jnp.dot(seq_ref[...], wih_ref[l],
                             preferred_element_type=jnp.float32) + gib_ref[l]

        w_hh = whh_ref[l]                                                # (H, 3H)
        b_hn = bhn_ref[l]                                                # (1, H)
        h = h0_ref[l]                                                    # (B, H)

        for t in range(T):                  # static unroll: T is small, indices static
            gi = gi_all[t * B:(t + 1) * B, :]                            # (B, 3H)
            gh = jnp.dot(h, w_hh, preferred_element_type=jnp.float32)    # (B, 3H)
            rz = jax.nn.sigmoid(gi[:, :H2] + gh[:, :H2])
            r = rz[:, :H]
            z = rz[:, H:]
            n = jnp.tanh(gi[:, H2:] + r * (gh[:, H2:] + b_hn))
            h = (1.0 - z) * n + z * h
            seq_ref[t * B:(t + 1) * B, :] = h

    # Fused, lane-dense output projection: one matmul + one unmasked store.
    out_ref[...] = jnp.dot(seq_ref[...], wout_ref[...],
                           preferred_element_type=jnp.float32) + bout_ref[...]


def decoder_rnn_forward(x, hn, params):
    """x: (T, B, 1) f32, hn: (L, B, H) f32  ->  out: (T, B, O) f32."""
    T, B, _ = x.shape
    L, _, H = hn.shape
    O = int(np.asarray(params["w_out"]).shape[0])
    O_pad = ((O + 127) // 128) * 128

    # ---- host-side weight packing (gate-fused, transposed for right-multiplication)
    wih = np.zeros((L, H, 3 * H), np.float32)   # slot 0 unused by the kernel
    whh = np.zeros((L, H, 3 * H), np.float32)
    gib = np.zeros((L, 1, 3 * H), np.float32)
    bhn = np.zeros((L, 1, H), np.float32)
    for l in range(L):
        w_ih_l = np.asarray(params[f"w_ih_l{l}"], np.float32)   # (3H, in_l)
        w_hh_l = np.asarray(params[f"w_hh_l{l}"], np.float32)   # (3H, H)
        b_ih_l = np.asarray(params[f"b_ih_l{l}"], np.float32)   # (3H,)
        b_hh_l = np.asarray(params[f"b_hh_l{l}"], np.float32)   # (3H,)
        in_l = w_ih_l.shape[1]
        wih[l, :in_l, :] = w_ih_l.T
        whh[l] = w_hh_l.T
        # fold b_ih + b_hh for the r/z gates; keep only b_ih for n (b_hh_n separate)
        gib[l, 0, :2 * H] = b_ih_l[:2 * H] + b_hh_l[:2 * H]
        gib[l, 0, 2 * H:] = b_ih_l[2 * H:]
        bhn[l, 0] = b_hh_l[2 * H:]

    wout = np.zeros((H, O_pad), np.float32)
    wout[:, :O] = np.asarray(params["w_out"], np.float32).T
    bout = np.zeros((1, O_pad), np.float32)
    bout[0, :O] = np.asarray(params["b_out"], np.float32)

    # ---- layer-0 input gates: input width is 1 -> pure broadcast multiply (no MXU)
    w0_row = jnp.asarray(np.asarray(params["w_ih_l0"], np.float32).T)    # (1, 3H)
    gi0 = (jnp.asarray(x, jnp.float32) * w0_row + jnp.asarray(gib[0]))   # (T, B, 3H)
    gi0 = gi0.reshape(T * B, 3 * H)

    vmem = pl.BlockSpec(memory_space=pltpu.MemorySpace.VMEM)
    out_flat = pl.pallas_call(
        _gru_decoder_kernel,
        out_shape=jax.ShapeDtypeStruct((T * B, O_pad), jnp.float32),
        in_specs=[vmem] * 8,
        out_specs=vmem,
        scratch_shapes=[pltpu.VMEM((T * B, H), jnp.float32)],
    )(gi0, jnp.asarray(hn, jnp.float32),
      jnp.asarray(wih), jnp.asarray(whh),
      jnp.asarray(gib), jnp.asarray(bhn),
      jnp.asarray(wout), jnp.asarray(bout))

    return out_flat[:, :O].reshape(T, B, O)


def init_params(key, hidden_size, output_size, num_layer):
    """Deterministic init matching PyTorch shapes (uniform +-1/sqrt(H))."""
    H, O, L = hidden_size, output_size, num_layer
    k = 1.0 / np.sqrt(H)
    params = {}
    keys = jax.random.split(key, 4 * L + 2)
    idx = 0
    for l in range(L):
        in_l = 1 if l == 0 else H
        params[f"w_ih_l{l}"] = jax.random.uniform(keys[idx], (3 * H, in_l), jnp.float32, -k, k); idx += 1
        params[f"w_hh_l{l}"] = jax.random.uniform(keys[idx], (3 * H, H), jnp.float32, -k, k); idx += 1
        params[f"b_ih_l{l}"] = jax.random.uniform(keys[idx], (3 * H,), jnp.float32, -k, k); idx += 1
        params[f"b_hh_l{l}"] = jax.random.uniform(keys[idx], (3 * H,), jnp.float32, -k, k); idx += 1
    params["w_out"] = jax.random.uniform(keys[idx], (O, H), jnp.float32, -k, k); idx += 1
    params["b_out"] = jax.random.uniform(keys[idx], (O,), jnp.float32, -k, k)
    return params


def ref_forward(x, hn, params):
    """Pure-numpy reference of the PyTorch Decoder_RNN forward."""
    x = np.asarray(x, np.float32)
    hn = np.asarray(hn, np.float32)
    T, B, _ = x.shape
    L, _, H = hn.shape

    def sigm(v):
        return 1.0 / (1.0 + np.exp(-v))

    inp = x
    for l in range(L):
        w_ih = np.asarray(params[f"w_ih_l{l}"]); w_hh = np.asarray(params[f"w_hh_l{l}"])
        b_ih = np.asarray(params[f"b_ih_l{l}"]); b_hh = np.asarray(params[f"b_hh_l{l}"])
        h = hn[l]
        outs = []
        for t in range(T):
            gi = inp[t] @ w_ih.T + b_ih
            gh = h @ w_hh.T + b_hh
            i_r, i_z, i_n = np.split(gi, 3, axis=1)
            h_r, h_z, h_n = np.split(gh, 3, axis=1)
            r = sigm(i_r + h_r)
            z = sigm(i_z + h_z)
            n = np.tanh(i_n + r * h_n)
            h = (1.0 - z) * n + z * h
            outs.append(h)
        inp = np.stack(outs)
    return inp @ np.asarray(params["w_out"]).T + np.asarray(params["b_out"])


if __name__ == "__main__":
    T, B, H, O, L = 8, 2, 32, 8, 2   # seq=8, batch=2, hidden=32, output=8, 2 GRU layers
    key = jax.random.PRNGKey(0)
    pkey, xkey, hkey = jax.random.split(key, 3)
    params = init_params(pkey, H, O, L)
    x = jax.random.normal(xkey, (T, B, 1), jnp.float32)
    hn = jax.random.normal(hkey, (L, B, H), jnp.float32)

    out = decoder_rnn_forward(x, hn, params)
    out = jax.block_until_ready(out)

    ref = ref_forward(x, hn, params)
    assert out.shape == (T, B, O)
    np.testing.assert_allclose(np.asarray(out), ref, rtol=2e-3, atol=2e-3)
    print("KERNEL_OK")
</pallas_src>

<mosaic_0001>
module attributes {stable_mosaic.version = 11 : i64} {
  func.func @_gru_decoder_kernel(%arg0: memref<16x96xf32, #tpu.memory_space<vmem>>, %arg1: memref<2x2x32xf32, #tpu.memory_space<vmem>>, %arg2: memref<2x32x96xf32, #tpu.memory_space<vmem>>, %arg3: memref<2x32x96xf32, #tpu.memory_space<vmem>>, %arg4: memref<2x1x96xf32, #tpu.memory_space<vmem>>, %arg5: memref<2x1x32xf32, #tpu.memory_space<vmem>>, %arg6: memref<32x128xf32, #tpu.memory_space<vmem>>, %arg7: memref<1x128xf32, #tpu.memory_space<vmem>>, %arg8: memref<16x128xf32, #tpu.memory_space<vmem>>, %arg9: memref<16x32xf32, #tpu.memory_space<vmem>>) attributes {dimension_semantics = [], scalar_prefetch = 0 : i64, scratch_operands = 1 : i64, tpu.core_type = #tpu.core_type<tc>} {
    %c0 = arith.constant 0 : index
    %c0_0 = arith.constant 0 : index
    %0 = vector.load %arg0[%c0, %c0_0] : memref<16x96xf32, #tpu.memory_space<vmem>>, vector<16x96xf32>
    %c0_1 = arith.constant 0 : index
    %c0_2 = arith.constant 0 : index
    %c0_3 = arith.constant 0 : index
    %1 = vector.load %arg3[%c0_1, %c0_2, %c0_3] : memref<2x32x96xf32, #tpu.memory_space<vmem>>, vector<1x32x96xf32>
    %2 = vector.shape_cast %1 : vector<1x32x96xf32> to vector<32x96xf32>
    %c0_4 = arith.constant 0 : index
    %c0_5 = arith.constant 0 : index
    %c0_6 = arith.constant 0 : index
    %3 = vector.load %arg5[%c0_4, %c0_5, %c0_6] : memref<2x1x32xf32, #tpu.memory_space<vmem>>, vector<1x1x32xf32>
    %4 = vector.shape_cast %3 : vector<1x1x32xf32> to vector<1x32xf32>
    %c0_7 = arith.constant 0 : index
    %c0_8 = arith.constant 0 : index
    %c0_9 = arith.constant 0 : index
    %5 = vector.load %arg1[%c0_7, %c0_8, %c0_9] : memref<2x2x32xf32, #tpu.memory_space<vmem>>, vector<1x2x32xf32>
    %6 = vector.shape_cast %5 : vector<1x2x32xf32> to vector<2x32xf32>
    %7 = vector.extract_strided_slice %0 {offsets = [0, 0], sizes = [2, 96], strides = [1, 1]} : vector<16x96xf32> to vector<2x96xf32>
    %cst = arith.constant dense<0.000000e+00> : vector<2x96xf32>
    %8 = tpu.matmul %6, %2, %cst {dimension_numbers = #tpu.dot_dimension_numbers<[1], [0], [0], [1], [0, 0, 1, 1], [], []>} : vector<2x32xf32>, vector<32x96xf32>, vector<2x96xf32> -> vector<2x96xf32>
    %9 = vector.extract_strided_slice %7 {offsets = [0, 0], sizes = [2, 64], strides = [1, 1]} : vector<2x96xf32> to vector<2x64xf32>
    %10 = vector.extract_strided_slice %8 {offsets = [0, 0], sizes = [2, 64], strides = [1, 1]} : vector<2x96xf32> to vector<2x64xf32>
    %11 = arith.addf %9, %10 : vector<2x64xf32>
    %12 = arith.negf %11 : vector<2x64xf32>
    %13 = math.exp %12 : vector<2x64xf32>
    %cst_10 = arith.constant 1.000000e+00 : f32
    %14 = vector.broadcast %cst_10 : f32 to vector<2x64xf32>
    %15 = arith.addf %14, %13 : vector<2x64xf32>
    %16 = arith.divf %14, %15 : vector<2x64xf32>
    %17 = vector.extract_strided_slice %16 {offsets = [0, 0], sizes = [2, 32], strides = [1, 1]} : vector<2x64xf32> to vector<2x32xf32>
    %18 = vector.extract_strided_slice %16 {offsets = [0, 32], sizes = [2, 32], strides = [1, 1]} : vector<2x64xf32> to vector<2x32xf32>
    %19 = vector.extract_strided_slice %7 {offsets = [0, 64], sizes = [2, 32], strides = [1, 1]} : vector<2x96xf32> to vector<2x32xf32>
    %20 = vector.extract_strided_slice %8 {offsets = [0, 64], sizes = [2, 32], strides = [1, 1]} : vector<2x96xf32> to vector<2x32xf32>
    %21 = vector.broadcast %4 : vector<1x32xf32> to vector<2x32xf32>
    %22 = arith.addf %20, %21 : vector<2x32xf32>
    %23 = arith.mulf %17, %22 : vector<2x32xf32>
    %24 = arith.addf %19, %23 : vector<2x32xf32>
    %25 = math.tanh %24 : vector<2x32xf32>
    %cst_11 = arith.constant 1.000000e+00 : f32
    %26 = vector.broadcast %cst_11 : f32 to vector<2x32xf32>
    %27 = arith.subf %26, %18 : vector<2x32xf32>
    %28 = arith.mulf %27, %25 : vector<2x32xf32>
    %29 = arith.mulf %18, %6 : vector<2x32xf32>
    %30 = arith.addf %28, %29 : vector<2x32xf32>
    %c0_12 = arith.constant 0 : index
    %c0_13 = arith.constant 0 : index
    %31 = vector.load %arg9[%c0_12, %c0_13] : memref<16x32xf32, #tpu.memory_space<vmem>>, vector<2x32xf32>
    tpu.vector_store %arg9[%c0_12, %c0_13], %30 {strides = array<i32>} : memref<16x32xf32, #tpu.memory_space<vmem>>, vector<2x32xf32>,
    %32 = vector.extract_strided_slice %0 {offsets = [2, 0], sizes = [2, 96], strides = [1, 1]} : vector<16x96xf32> to vector<2x96xf32>
    %cst_14 = arith.constant dense<0.000000e+00> : vector<2x96xf32>
    %33 = tpu.matmul %30, %2, %cst_14 {dimension_numbers = #tpu.dot_dimension_numbers<[1], [0], [0], [1], [0, 0, 1, 1], [], []>} : vector<2x32xf32>, vector<32x96xf32>, vector<2x96xf32> -> vector<2x96xf32>
    %34 = vector.extract_strided_slice %32 {offsets = [0, 0], sizes = [2, 64], strides = [1, 1]} : vector<2x96xf32> to vector<2x64xf32>
    %35 = vector.extract_strided_slice %33 {offsets = [0, 0], sizes = [2, 64], strides = [1, 1]} : vector<2x96xf32> to vector<2x64xf32>
    %36 = arith.addf %34, %35 : vector<2x64xf32>
    %37 = arith.negf %36 : vector<2x64xf32>
    %38 = math.exp %37 : vector<2x64xf32>
    %cst_15 = arith.constant 1.000000e+00 : f32
    %39 = vector.broadcast %cst_15 : f32 to vector<2x64xf32>
    %40 = arith.addf %39, %38 : vector<2x64xf32>
    %41 = arith.divf %39, %40 : vector<2x64xf32>
    %42 = vector.extract_strided_slice %41 {offsets = [0, 0], sizes = [2, 32], strides = [1, 1]} : vector<2x64xf32> to vector<2x32xf32>
    %43 = vector.extract_strided_slice %41 {offsets = [0, 32], sizes = [2, 32], strides = [1, 1]} : vector<2x64xf32> to vector<2x32xf32>
    %44 = vector.extract_strided_slice %32 {offsets = [0, 64], sizes = [2, 32], strides = [1, 1]} : vector<2x96xf32> to vector<2x32xf32>
    %45 = vector.extract_strided_slice %33 {offsets = [0, 64], sizes = [2, 32], strides = [1, 1]} : vector<2x96xf32> to vector<2x32xf32>
    %46 = vector.broadcast %4 : vector<1x32xf32> to vector<2x32xf32>
    %47 = arith.addf %45, %46 : vector<2x32xf32>
    %48 = arith.mulf %42, %47 : vector<2x32xf32>
    %49 = arith.addf %44, %48 : vector<2x32xf32>
    %50 = math.tanh %49 : vector<2x32xf32>
    %cst_16 = arith.constant 1.000000e+00 : f32
    %51 = vector.broadcast %cst_16 : f32 to vector<2x32xf32>
    %52 = arith.subf %51, %43 : vector<2x32xf32>
    %53 = arith.mulf %52, %50 : vector<2x32xf32>
    %54 = arith.mulf %43, %30 : vector<2x32xf32>
    %55 = arith.addf %53, %54 : vector<2x32xf32>
    %c2 = arith.constant 2 : index
    %c0_17 = arith.constant 0 : index
    %56 = vector.load %arg9[%c2, %c0_17] : memref<16x32xf32, #tpu.memory_space<vmem>>, vector<2x32xf32>
    tpu.vector_store %arg9[%c2, %c0_17], %55 {strides = array<i32>} : memref<16x32xf32, #tpu.memory_space<vmem>>, vector<2x32xf32>,
    %57 = vector.extract_strided_slice %0 {offsets = [4, 0], sizes = [2, 96], strides = [1, 1]} : vector<16x96xf32> to vector<2x96xf32>
    %cst_18 = arith.constant dense<0.000000e+00> : vector<2x96xf32>
    %58 = tpu.matmul %55, %2, %cst_18 {dimension_numbers = #tpu.dot_dimension_numbers<[1], [0], [0], [1], [0, 0, 1, 1], [], []>} : vector<2x32xf32>, vector<32x96xf32>, vector<2x96xf32> -> vector<2x96xf32>
    %59 = vector.extract_strided_slice %57 {offsets = [0, 0], sizes = [2, 64], strides = [1, 1]} : vector<2x96xf32> to vector<2x64xf32>
    %60 = vector.extract_strided_slice %58 {offsets = [0, 0], sizes = [2, 64], strides = [1, 1]} : vector<2x96xf32> to vector<2x64xf32>
    %61 = arith.addf %59, %60 : vector<2x64xf32>
    %62 = arith.negf %61 : vector<2x64xf32>
    %63 = math.exp %62 : vector<2x64xf32>
    %cst_19 = arith.constant 1.000000e+00 : f32
    %64 = vector.broadcast %cst_19 : f32 to vector<2x64xf32>
    %65 = arith.addf %64, %63 : vector<2x64xf32>
    %66 = arith.divf %64, %65 : vector<2x64xf32>
    %67 = vector.extract_strided_slice %66 {offsets = [0, 0], sizes = [2, 32], strides = [1, 1]} : vector<2x64xf32> to vector<2x32xf32>
    %68 = vector.extract_strided_slice %66 {offsets = [0, 32], sizes = [2, 32], strides = [1, 1]} : vector<2x64xf32> to vector<2x32xf32>
    %69 = vector.extract_strided_slice %57 {offsets = [0, 64], sizes = [2, 32], strides = [1, 1]} : vector<2x96xf32> to vector<2x32xf32>
    %70 = vector.extract_strided_slice %58 {offsets = [0, 64], sizes = [2, 32], strides = [1, 1]} : vector<2x96xf32> to vector<2x32xf32>
    %71 = vector.broadcast %4 : vector<1x32xf32> to vector<2x32xf32>
    %72 = arith.addf %70, %71 : vector<2x32xf32>
    %73 = arith.mulf %67, %72 : vector<2x32xf32>
    %74 = arith.addf %69, %73 : vector<2x32xf32>
    %75 = math.tanh %74 : vector<2x32xf32>
    %cst_20 = arith.constant 1.000000e+00 : f32
    %76 = vector.broadcast %cst_20 : f32 to vector<2x32xf32>
    %77 = arith.subf %76, %68 : vector<2x32xf32>
    %78 = arith.mulf %77, %75 : vector<2x32xf32>
    %79 = arith.mulf %68, %55 : vector<2x32xf32>
    %80 = arith.addf %78, %79 : vector<2x32xf32>
    %c4 = arith.constant 4 : index
    %c0_21 = arith.constant 0 : index
    %81 = vector.load %arg9[%c4, %c0_21] : memref<16x32xf32, #tpu.memory_space<vmem>>, vector<2x32xf32>
    tpu.vector_store %arg9[%c4, %c0_21], %80 {strides = array<i32>} : memref<16x32xf32, #tpu.memory_space<vmem>>, vector<2x32xf32>,
    %82 = vector.extract_strided_slice %0 {offsets = [6, 0], sizes = [2, 96], strides = [1, 1]} : vector<16x96xf32> to vector<2x96xf32>
    %cst_22 = arith.constant dense<0.000000e+00> : vector<2x96xf32>
    %83 = tpu.matmul %80, %2, %cst_22 {dimension_numbers = #tpu.dot_dimension_numbers<[1], [0], [0], [1], [0, 0, 1, 1], [], []>} : vector<2x32xf32>, vector<32x96xf32>, vector<2x96xf32> -> vector<2x96xf32>
    %84 = vector.extract_strided_slice %82 {offsets = [0, 0], sizes = [2, 64], strides = [1, 1]} : vector<2x96xf32> to vector<2x64xf32>
    %85 = vector.extract_strided_slice %83 {offsets = [0, 0], sizes = [2, 64], strides = [1, 1]} : vector<2x96xf32> to vector<2x64xf32>
    %86 = arith.addf %84, %85 : vector<2x64xf32>
    %87 = arith.negf %86 : vector<2x64xf32>
    %88 = math.exp %87 : vector<2x64xf32>
    %cst_23 = arith.constant 1.000000e+00 : f32
    %89 = vector.broadcast %cst_23 : f32 to vector<2x64xf32>
    %90 = arith.addf %89, %88 : vector<2x64xf32>
    %91 = arith.divf %89, %90 : vector<2x64xf32>
    %92 = vector.extract_strided_slice %91 {offsets = [0, 0], sizes = [2, 32], strides = [1, 1]} : vector<2x64xf32> to vector<2x32xf32>
    %93 = vector.extract_strided_slice %91 {offsets = [0, 32], sizes = [2, 32], strides = [1, 1]} : vector<2x64xf32> to vector<2x32xf32>
    %94 = vector.extract_strided_slice %82 {offsets = [0, 64], sizes = [2, 32], strides = [1, 1]} : vector<2x96xf32> to vector<2x32xf32>
    %95 = vector.extract_strided_slice %83 {offsets = [0, 64], sizes = [2, 32], strides = [1, 1]} : vector<2x96xf32> to vector<2x32xf32>
    %96 = vector.broadcast %4 : vector<1x32xf32> to vector<2x32xf32>
    %97 = arith.addf %95, %96 : vector<2x32xf32>
    %98 = arith.mulf %92, %97 : vector<2x32xf32>
    %99 = arith.addf %94, %98 : vector<2x32xf32>
    %100 = math.tanh %99 : vector<2x32xf32>
    %cst_24 = arith.constant 1.000000e+00 : f32
    %101 = vector.broadcast %cst_24 : f32 to vector<2x32xf32>
    %102 = arith.subf %101, %93 : vector<2x32xf32>
    %103 = arith.mulf %102, %100 : vector<2x32xf32>
    %104 = arith.mulf %93, %80 : vector<2x32xf32>
    %105 = arith.addf %103, %104 : vector<2x32xf32>
    %c6 = arith.constant 6 : index
    %c0_25 = arith.constant 0 : index
    %106 = vector.load %arg9[%c6, %c0_25] : memref<16x32xf32, #tpu.memory_space<vmem>>, vector<2x32xf32>
    tpu.vector_store %arg9[%c6, %c0_25], %105 {strides = array<i32>} : memref<16x32xf32, #tpu.memory_space<vmem>>, vector<2x32xf32>,
    %107 = vector.extract_strided_slice %0 {offsets = [8, 0], sizes = [2, 96], strides = [1, 1]} : vector<16x96xf32> to vector<2x96xf32>
    %cst_26 = arith.constant dense<0.000000e+00> : vector<2x96xf32>
    %108 = tpu.matmul %105, %2, %cst_26 {dimension_numbers = #tpu.dot_dimension_numbers<[1], [0], [0], [1], [0, 0, 1, 1], [], []>} : vector<2x32xf32>, vector<32x96xf32>, vector<2x96xf32> -> vector<2x96xf32>
    %109 = vector.extract_strided_slice %107 {offsets = [0, 0], sizes = [2, 64], strides = [1, 1]} : vector<2x96xf32> to vector<2x64xf32>
    %110 = vector.extract_strided_slice %108 {offsets = [0, 0], sizes = [2, 64], strides = [1, 1]} : vector<2x96xf32> to vector<2x64xf32>
    %111 = arith.addf %109, %110 : vector<2x64xf32>
    %112 = arith.negf %111 : vector<2x64xf32>
    %113 = math.exp %112 : vector<2x64xf32>
    %cst_27 = arith.constant 1.000000e+00 : f32
    %114 = vector.broadcast %cst_27 : f32 to vector<2x64xf32>
    %115 = arith.addf %114, %113 : vector<2x64xf32>
    %116 = arith.divf %114, %115 : vector<2x64xf32>
    %117 = vector.extract_strided_slice %116 {offsets = [0, 0], sizes = [2, 32], strides = [1, 1]} : vector<2x64xf32> to vector<2x32xf32>
    %118 = vector.extract_strided_slice %116 {offsets = [0, 32], sizes = [2, 32], strides = [1, 1]} : vector<2x64xf32> to vector<2x32xf32>
    %119 = vector.extract_strided_slice %107 {offsets = [0, 64], sizes = [2, 32], strides = [1, 1]} : vector<2x96xf32> to vector<2x32xf32>
    %120 = vector.extract_strided_slice %108 {offsets = [0, 64], sizes = [2, 32], strides = [1, 1]} : vector<2x96xf32> to vector<2x32xf32>
    %121 = vector.broadcast %4 : vector<1x32xf32> to vector<2x32xf32>
    %122 = arith.addf %120, %121 : vector<2x32xf32>
    %123 = arith.mulf %117, %122 : vector<2x32xf32>
    %124 = arith.addf %119, %123 : vector<2x32xf32>
    %125 = math.tanh %124 : vector<2x32xf32>
    %cst_28 = arith.constant 1.000000e+00 : f32
    %126 = vector.broadcast %cst_28 : f32 to vector<2x32xf32>
    %127 = arith.subf %126, %118 : vector<2x32xf32>
    %128 = arith.mulf %127, %125 : vector<2x32xf32>
    %129 = arith.mulf %118, %105 : vector<2x32xf32>
    %130 = arith.addf %128, %129 : vector<2x32xf32>
    %c8 = arith.constant 8 : index
    %c0_29 = arith.constant 0 : index
    %131 = vector.load %arg9[%c8, %c0_29] : memref<16x32xf32, #tpu.memory_space<vmem>>, vector<2x32xf32>
    tpu.vector_store %arg9[%c8, %c0_29], %130 {strides = array<i32>} : memref<16x32xf32, #tpu.memory_space<vmem>>, vector<2x32xf32>,
    %132 = vector.extract_strided_slice %0 {offsets = [10, 0], sizes = [2, 96], strides = [1, 1]} : vector<16x96xf32> to vector<2x96xf32>
    %cst_30 = arith.constant dense<0.000000e+00> : vector<2x96xf32>
    %133 = tpu.matmul %130, %2, %cst_30 {dimension_numbers = #tpu.dot_dimension_numbers<[1], [0], [0], [1], [0, 0, 1, 1], [], []>} : vector<2x32xf32>, vector<32x96xf32>, vector<2x96xf32> -> vector<2x96xf32>
    %134 = vector.extract_strided_slice %132 {offsets = [0, 0], sizes = [2, 64], strides = [1, 1]} : vector<2x96xf32> to vector<2x64xf32>
    %135 = vector.extract_strided_slice %133 {offsets = [0, 0], sizes = [2, 64], strides = [1, 1]} : vector<2x96xf32> to vector<2x64xf32>
    %136 = arith.addf %134, %135 : vector<2x64xf32>
    %137 = arith.negf %136 : vector<2x64xf32>
    %138 = math.exp %137 : vector<2x64xf32>
    %cst_31 = arith.constant 1.000000e+00 : f32
    %139 = vector.broadcast %cst_31 : f32 to vector<2x64xf32>
    %140 = arith.addf %139, %138 : vector<2x64xf32>
    %141 = arith.divf %139, %140 : vector<2x64xf32>
    %142 = vector.extract_strided_slice %141 {offsets = [0, 0], sizes = [2, 32], strides = [1, 1]} : vector<2x64xf32> to vector<2x32xf32>
    %143 = vector.extract_strided_slice %141 {offsets = [0, 32], sizes = [2, 32], strides = [1, 1]} : vector<2x64xf32> to vector<2x32xf32>
    %144 = vector.extract_strided_slice %132 {offsets = [0, 64], sizes = [2, 32], strides = [1, 1]} : vector<2x96xf32> to vector<2x32xf32>
    %145 = vector.extract_strided_slice %133 {offsets = [0, 64], sizes = [2, 32], strides = [1, 1]} : vector<2x96xf32> to vector<2x32xf32>
    %146 = vector.broadcast %4 : vector<1x32xf32> to vector<2x32xf32>
    %147 = arith.addf %145, %146 : vector<2x32xf32>
    %148 = arith.mulf %142, %147 : vector<2x32xf32>
    %149 = arith.addf %144, %148 : vector<2x32xf32>
    %150 = math.tanh %149 : vector<2x32xf32>
    %cst_32 = arith.constant 1.000000e+00 : f32
    %151 = vector.broadcast %cst_32 : f32 to vector<2x32xf32>
    %152 = arith.subf %151, %143 : vector<2x32xf32>
    %153 = arith.mulf %152, %150 : vector<2x32xf32>
    %154 = arith.mulf %143, %130 : vector<2x32xf32>
    %155 = arith.addf %153, %154 : vector<2x32xf32>
    %c10 = arith.constant 10 : index
    %c0_33 = arith.constant 0 : index
    %156 = vector.load %arg9[%c10, %c0_33] : memref<16x32xf32, #tpu.memory_space<vmem>>, vector<2x32xf32>
    tpu.vector_store %arg9[%c10, %c0_33], %155 {strides = array<i32>} : memref<16x32xf32, #tpu.memory_space<vmem>>, vector<2x32xf32>,
    %157 = vector.extract_strided_slice %0 {offsets = [12, 0], sizes = [2, 96], strides = [1, 1]} : vector<16x96xf32> to vector<2x96xf32>
    %cst_34 = arith.constant dense<0.000000e+00> : vector<2x96xf32>
    %158 = tpu.matmul %155, %2, %cst_34 {dimension_numbers = #tpu.dot_dimension_numbers<[1], [0], [0], [1], [0, 0, 1, 1], [], []>} : vector<2x32xf32>, vector<32x96xf32>, vector<2x96xf32> -> vector<2x96xf32>
    %159 = vector.extract_strided_slice %157 {offsets = [0, 0], sizes = [2, 64], strides = [1, 1]} : vector<2x96xf32> to vector<2x64xf32>
    %160 = vector.extract_strided_slice %158 {offsets = [0, 0], sizes = [2, 64], strides = [1, 1]} : vector<2x96xf32> to vector<2x64xf32>
    %161 = arith.addf %159, %160 : vector<2x64xf32>
    %162 = arith.negf %161 : vector<2x64xf32>
    %163 = math.exp %162 : vector<2x64xf32>
    %cst_35 = arith.constant 1.000000e+00 : f32
    %164 = vector.broadcast %cst_35 : f32 to vector<2x64xf32>
    %165 = arith.addf %164, %163 : vector<2x64xf32>
    %166 = arith.divf %164, %165 : vector<2x64xf32>
    %167 = vector.extract_strided_slice %166 {offsets = [0, 0], sizes = [2, 32], strides = [1, 1]} : vector<2x64xf32> to vector<2x32xf32>
    %168 = vector.extract_strided_slice %166 {offsets = [0, 32], sizes = [2, 32], strides = [1, 1]} : vector<2x64xf32> to vector<2x32xf32>
    %169 = vector.extract_strided_slice %157 {offsets = [0, 64], sizes = [2, 32], strides = [1, 1]} : vector<2x96xf32> to vector<2x32xf32>
    %170 = vector.extract_strided_slice %158 {offsets = [0, 64], sizes = [2, 32], strides = [1, 1]} : vector<2x96xf32> to vector<2x32xf32>
    %171 = vector.broadcast %4 : vector<1x32xf32> to vector<2x32xf32>
    %172 = arith.addf %170, %171 : vector<2x32xf32>
    %173 = arith.mulf %167, %172 : vector<2x32xf32>
    %174 = arith.addf %169, %173 : vector<2x32xf32>
    %175 = math.tanh %174 : vector<2x32xf32>
    %cst_36 = arith.constant 1.000000e+00 : f32
    %176 = vector.broadcast %cst_36 : f32 to vector<2x32xf32>
    %177 = arith.subf %176, %168 : vector<2x32xf32>
    %178 = arith.mulf %177, %175 : vector<2x32xf32>
    %179 = arith.mulf %168, %155 : vector<2x32xf32>
    %180 = arith.addf %178, %179 : vector<2x32xf32>
    %c12 = arith.constant 12 : index
    %c0_37 = arith.constant 0 : index
    %181 = vector.load %arg9[%c12, %c0_37] : memref<16x32xf32, #tpu.memory_space<vmem>>, vector<2x32xf32>
    tpu.vector_store %arg9[%c12, %c0_37], %180 {strides = array<i32>} : memref<16x32xf32, #tpu.memory_space<vmem>>, vector<2x32xf32>,
    %182 = vector.extract_strided_slice %0 {offsets = [14, 0], sizes = [2, 96], strides = [1, 1]} : vector<16x96xf32> to vector<2x96xf32>
    %cst_38 = arith.constant dense<0.000000e+00> : vector<2x96xf32>
    %183 = tpu.matmul %180, %2, %cst_38 {dimension_numbers = #tpu.dot_dimension_numbers<[1], [0], [0], [1], [0, 0, 1, 1], [], []>} : vector<2x32xf32>, vector<32x96xf32>, vector<2x96xf32> -> vector<2x96xf32>
    %184 = vector.extract_strided_slice %182 {offsets = [0, 0], sizes = [2, 64], strides = [1, 1]} : vector<2x96xf32> to vector<2x64xf32>
    %185 = vector.extract_strided_slice %183 {offsets = [0, 0], sizes = [2, 64], strides = [1, 1]} : vector<2x96xf32> to vector<2x64xf32>
    %186 = arith.addf %184, %185 : vector<2x64xf32>
    %187 = arith.negf %186 : vector<2x64xf32>
    %188 = math.exp %187 : vector<2x64xf32>
    %cst_39 = arith.constant 1.000000e+00 : f32
    %189 = vector.broadcast %cst_39 : f32 to vector<2x64xf32>
    %190 = arith.addf %189, %188 : vector<2x64xf32>
    %191 = arith.divf %189, %190 : vector<2x64xf32>
    %192 = vector.extract_strided_slice %191 {offsets = [0, 0], sizes = [2, 32], strides = [1, 1]} : vector<2x64xf32> to vector<2x32xf32>
    %193 = vector.extract_strided_slice %191 {offsets = [0, 32], sizes = [2, 32], strides = [1, 1]} : vector<2x64xf32> to vector<2x32xf32>
    %194 = vector.extract_strided_slice %182 {offsets = [0, 64], sizes = [2, 32], strides = [1, 1]} : vector<2x96xf32> to vector<2x32xf32>
    %195 = vector.extract_strided_slice %183 {offsets = [0, 64], sizes = [2, 32], strides = [1, 1]} : vector<2x96xf32> to vector<2x32xf32>
    %196 = vector.broadcast %4 : vector<1x32xf32> to vector<2x32xf32>
    %197 = arith.addf %195, %196 : vector<2x32xf32>
    %198 = arith.mulf %192, %197 : vector<2x32xf32>
    %199 = arith.addf %194, %198 : vector<2x32xf32>
    %200 = math.tanh %199 : vector<2x32xf32>
    %cst_40 = arith.constant 1.000000e+00 : f32
    %201 = vector.broadcast %cst_40 : f32 to vector<2x32xf32>
    %202 = arith.subf %201, %193 : vector<2x32xf32>
    %203 = arith.mulf %202, %200 : vector<2x32xf32>
    %204 = arith.mulf %193, %180 : vector<2x32xf32>
    %205 = arith.addf %203, %204 : vector<2x32xf32>
    %c14 = arith.constant 14 : index
    %c0_41 = arith.constant 0 : index
    %206 = vector.load %arg9[%c14, %c0_41] : memref<16x32xf32, #tpu.memory_space<vmem>>, vector<2x32xf32>
    tpu.vector_store %arg9[%c14, %c0_41], %205 {strides = array<i32>} : memref<16x32xf32, #tpu.memory_space<vmem>>, vector<2x32xf32>,
    %c0_42 = arith.constant 0 : index
    %c0_43 = arith.constant 0 : index
    %207 = vector.load %arg9[%c0_42, %c0_43] : memref<16x32xf32, #tpu.memory_space<vmem>>, vector<16x32xf32>
    %c1 = arith.constant 1 : index
    %c0_44 = arith.constant 0 : index
    %c0_45 = arith.constant 0 : index
    %208 = vector.load %arg2[%c1, %c0_44, %c0_45] : memref<2x32x96xf32, #tpu.memory_space<vmem>>, vector<1x32x96xf32>
    %209 = vector.shape_cast %208 : vector<1x32x96xf32> to vector<32x96xf32>
    %cst_46 = arith.constant dense<0.000000e+00> : vector<16x96xf32>
    %210 = tpu.matmul %207, %209, %cst_46 {dimension_numbers = #tpu.dot_dimension_numbers<[1], [0], [0], [1], [0, 0, 1, 1], [], []>} : vector<16x32xf32>, vector<32x96xf32>, vector<16x96xf32> -> vector<16x96xf32>
    %c1_47 = arith.constant 1 : index
    %c0_48 = arith.constant 0 : index
    %c0_49 = arith.constant 0 : index
    %211 = vector.load %arg4[%c1_47, %c0_48, %c0_49] : memref<2x1x96xf32, #tpu.memory_space<vmem>>, vector<1x1x96xf32>
    %212 = vector.shape_cast %211 : vector<1x1x96xf32> to vector<1x96xf32>
    %213 = vector.broadcast %212 : vector<1x96xf32> to vector<16x96xf32>
    %214 = arith.addf %210, %213 : vector<16x96xf32>
    %c1_50 = arith.constant 1 : index
    %c0_51 = arith.constant 0 : index
    %c0_52 = arith.constant 0 : index
    %215 = vector.load %arg3[%c1_50, %c0_51, %c0_52] : memref<2x32x96xf32, #tpu.memory_space<vmem>>, vector<1x32x96xf32>
    %216 = vector.shape_cast %215 : vector<1x32x96xf32> to vector<32x96xf32>
    %c1_53 = arith.constant 1 : index
    %c0_54 = arith.constant 0 : index
    %c0_55 = arith.constant 0 : index
    %217 = vector.load %arg5[%c1_53, %c0_54, %c0_55] : memref<2x1x32xf32, #tpu.memory_space<vmem>>, vector<1x1x32xf32>
    %218 = vector.shape_cast %217 : vector<1x1x32xf32> to vector<1x32xf32>
    %c1_56 = arith.constant 1 : index
    %c0_57 = arith.constant 0 : index
    %c0_58 = arith.constant 0 : index
    %219 = vector.load %arg1[%c1_56, %c0_57, %c0_58] : memref<2x2x32xf32, #tpu.memory_space<vmem>>, vector<1x2x32xf32>
    %220 = vector.shape_cast %219 : vector<1x2x32xf32> to vector<2x32xf32>
    %221 = vector.extract_strided_slice %214 {offsets = [0, 0], sizes = [2, 96], strides = [1, 1]} : vector<16x96xf32> to vector<2x96xf32>
    %cst_59 = arith.constant dense<0.000000e+00> : vector<2x96xf32>
    %222 = tpu.matmul %220, %216, %cst_59 {dimension_numbers = #tpu.dot_dimension_numbers<[1], [0], [0], [1], [0, 0, 1, 1], [], []>} : vector<2x32xf32>, vector<32x96xf32>, vector<2x96xf32> -> vector<2x96xf32>
    %223 = vector.extract_strided_slice %221 {offsets = [0, 0], sizes = [2, 64], strides = [1, 1]} : vector<2x96xf32> to vector<2x64xf32>
    %224 = vector.extract_strided_slice %222 {offsets = [0, 0], sizes = [2, 64], strides = [1, 1]} : vector<2x96xf32> to vector<2x64xf32>
    %225 = arith.addf %223, %224 : vector<2x64xf32>
    %226 = arith.negf %225 : vector<2x64xf32>
    %227 = math.exp %226 : vector<2x64xf32>
    %cst_60 = arith.constant 1.000000e+00 : f32
    %228 = vector.broadcast %cst_60 : f32 to vector<2x64xf32>
    %229 = arith.addf %228, %227 : vector<2x64xf32>
    %230 = arith.divf %228, %229 : vector<2x64xf32>
    %231 = vector.extract_strided_slice %230 {offsets = [0, 0], sizes = [2, 32], strides = [1, 1]} : vector<2x64xf32> to vector<2x32xf32>
    %232 = vector.extract_strided_slice %230 {offsets = [0, 32], sizes = [2, 32], strides = [1, 1]} : vector<2x64xf32> to vector<2x32xf32>
    %233 = vector.extract_strided_slice %221 {offsets = [0, 64], sizes = [2, 32], strides = [1, 1]} : vector<2x96xf32> to vector<2x32xf32>
    %234 = vector.extract_strided_slice %222 {offsets = [0, 64], sizes = [2, 32], strides = [1, 1]} : vector<2x96xf32> to vector<2x32xf32>
    %235 = vector.broadcast %218 : vector<1x32xf32> to vector<2x32xf32>
    %236 = arith.addf %234, %235 : vector<2x32xf32>
    %237 = arith.mulf %231, %236 : vector<2x32xf32>
    %238 = arith.addf %233, %237 : vector<2x32xf32>
    %239 = math.tanh %238 : vector<2x32xf32>
    %cst_61 = arith.constant 1.000000e+00 : f32
    %240 = vector.broadcast %cst_61 : f32 to vector<2x32xf32>
    %241 = arith.subf %240, %232 : vector<2x32xf32>
    %242 = arith.mulf %241, %239 : vector<2x32xf32>
    %243 = arith.mulf %232, %220 : vector<2x32xf32>
    %244 = arith.addf %242, %243 : vector<2x32xf32>
    %c0_62 = arith.constant 0 : index
    %c0_63 = arith.constant 0 : index
    %245 = vector.load %arg9[%c0_62, %c0_63] : memref<16x32xf32, #tpu.memory_space<vmem>>, vector<2x32xf32>
    tpu.vector_store %arg9[%c0_62, %c0_63], %244 {strides = array<i32>} : memref<16x32xf32, #tpu.memory_space<vmem>>, vector<2x32xf32>,
    %246 = vector.extract_strided_slice %214 {offsets = [2, 0], sizes = [2, 96], strides = [1, 1]} : vector<16x96xf32> to vector<2x96xf32>
    %cst_64 = arith.constant dense<0.000000e+00> : vector<2x96xf32>
    %247 = tpu.matmul %244, %216, %cst_64 {dimension_numbers = #tpu.dot_dimension_numbers<[1], [0], [0], [1], [0, 0, 1, 1], [], []>} : vector<2x32xf32>, vector<32x96xf32>, vector<2x96xf32> -> vector<2x96xf32>
    %248 = vector.extract_strided_slice %246 {offsets = [0, 0], sizes = [2, 64], strides = [1, 1]} : vector<2x96xf32> to vector<2x64xf32>
    %249 = vector.extract_strided_slice %247 {offsets = [0, 0], sizes = [2, 64], strides = [1, 1]} : vector<2x96xf32> to vector<2x64xf32>
    %250 = arith.addf %248, %249 : vector<2x64xf32>
    %251 = arith.negf %250 : vector<2x64xf32>
    %252 = math.exp %251 : vector<2x64xf32>
    %cst_65 = arith.constant 1.000000e+00 : f32
    %253 = vector.broadcast %cst_65 : f32 to vector<2x64xf32>
    %254 = arith.addf %253, %252 : vector<2x64xf32>
    %255 = arith.divf %253, %254 : vector<2x64xf32>
    %256 = vector.extract_strided_slice %255 {offsets = [0, 0], sizes = [2, 32], strides = [1, 1]} : vector<2x64xf32> to vector<2x32xf32>
    %257 = vector.extract_strided_slice %255 {offsets = [0, 32], sizes = [2, 32], strides = [1, 1]} : vector<2x64xf32> to vector<2x32xf32>
    %258 = vector.extract_strided_slice %246 {offsets = [0, 64], sizes = [2, 32], strides = [1, 1]} : vector<2x96xf32> to vector<2x32xf32>
    %259 = vector.extract_strided_slice %247 {offsets = [0, 64], sizes = [2, 32], strides = [1, 1]} : vector<2x96xf32> to vector<2x32xf32>
    %260 = vector.broadcast %218 : vector<1x32xf32> to vector<2x32xf32>
    %261 = arith.addf %259, %260 : vector<2x32xf32>
    %262 = arith.mulf %256, %261 : vector<2x32xf32>
    %263 = arith.addf %258, %262 : vector<2x32xf32>
    %264 = math.tanh %263 : vector<2x32xf32>
    %cst_66 = arith.constant 1.000000e+00 : f32
    %265 = vector.broadcast %cst_66 : f32 to vector<2x32xf32>
    %266 = arith.subf %265, %257 : vector<2x32xf32>
    %267 = arith.mulf %266, %264 : vector<2x32xf32>
    %268 = arith.mulf %257, %244 : vector<2x32xf32>
    %269 = arith.addf %267, %268 : vector<2x32xf32>
    %c2_67 = arith.constant 2 : index
    %c0_68 = arith.constant 0 : index
    %270 = vector.load %arg9[%c2_67, %c0_68] : memref<16x32xf32, #tpu.memory_space<vmem>>, vector<2x32xf32>
    tpu.vector_store %arg9[%c2_67, %c0_68], %269 {strides = array<i32>} : memref<16x32xf32, #tpu.memory_space<vmem>>, vector<2x32xf32>,
    %271 = vector.extract_strided_slice %214 {offsets = [4, 0], sizes = [2, 96], strides = [1, 1]} : vector<16x96xf32> to vector<2x96xf32>
    %cst_69 = arith.constant dense<0.000000e+00> : vector<2x96xf32>
    %272 = tpu.matmul %269, %216, %cst_69 {dimension_numbers = #tpu.dot_dimension_numbers<[1], [0], [0], [1], [0, 0, 1, 1], [], []>} : vector<2x32xf32>, vector<32x96xf32>, vector<2x96xf32> -> vector<2x96xf32>
    %273 = vector.extract_strided_slice %271 {offsets = [0, 0], sizes = [2, 64], strides = [1, 1]} : vector<2x96xf32> to vector<2x64xf32>
    %274 = vector.extract_strided_slice %272 {offsets = [0, 0], sizes = [2, 64], strides = [1, 1]} : vector<2x96xf32> to vector<2x64xf32>
    %275 = arith.addf %273, %274 : vector<2x64xf32>
    %276 = arith.negf %275 : vector<2x64xf32>
    %277 = math.exp %276 : vector<2x64xf32>
    %cst_70 = arith.constant 1.000000e+00 : f32
    %278 = vector.broadcast %cst_70 : f32 to vector<2x64xf32>
    %279 = arith.addf %278, %277 : vector<2x64xf32>
    %280 = arith.divf %278, %279 : vector<2x64xf32>
    %281 = vector.extract_strided_slice %280 {offsets = [0, 0], sizes = [2, 32], strides = [1, 1]} : vector<2x64xf32> to vector<2x32xf32>
    %282 = vector.extract_strided_slice %280 {offsets = [0, 32], sizes = [2, 32], strides = [1, 1]} : vector<2x64xf32> to vector<2x32xf32>
    %283 = vector.extract_strided_slice %271 {offsets = [0, 64], sizes = [2, 32], strides = [1, 1]} : vector<2x96xf32> to vector<2x32xf32>
    %284 = vector.extract_strided_slice %272 {offsets = [0, 64], sizes = [2, 32], strides = [1, 1]} : vector<2x96xf32> to vector<2x32xf32>
    %285 = vector.broadcast %218 : vector<1x32xf32> to vector<2x32xf32>
    %286 = arith.addf %284, %285 : vector<2x32xf32>
    %287 = arith.mulf %281, %286 : vector<2x32xf32>
    %288 = arith.addf %283, %287 : vector<2x32xf32>
    %289 = math.tanh %288 : vector<2x32xf32>
    %cst_71 = arith.constant 1.000000e+00 : f32
    %290 = vector.broadcast %cst_71 : f32 to vector<2x32xf32>
    %291 = arith.subf %290, %282 : vector<2x32xf32>
    %292 = arith.mulf %291, %289 : vector<2x32xf32>
    %293 = arith.mulf %282, %269 : vector<2x32xf32>
    %294 = arith.addf %292, %293 : vector<2x32xf32>
    %c4_72 = arith.constant 4 : index
    %c0_73 = arith.constant 0 : index
    %295 = vector.load %arg9[%c4_72, %c0_73] : memref<16x32xf32, #tpu.memory_space<vmem>>, vector<2x32xf32>
    tpu.vector_store %arg9[%c4_72, %c0_73], %294 {strides = array<i32>} : memref<16x32xf32, #tpu.memory_space<vmem>>, vector<2x32xf32>,
    %296 = vector.extract_strided_slice %214 {offsets = [6, 0], sizes = [2, 96], strides = [1, 1]} : vector<16x96xf32> to vector<2x96xf32>
    %cst_74 = arith.constant dense<0.000000e+00> : vector<2x96xf32>
    %297 = tpu.matmul %294, %216, %cst_74 {dimension_numbers = #tpu.dot_dimension_numbers<[1], [0], [0], [1], [0, 0, 1, 1], [], []>} : vector<2x32xf32>, vector<32x96xf32>, vector<2x96xf32> -> vector<2x96xf32>
    %298 = vector.extract_strided_slice %296 {offsets = [0, 0], sizes = [2, 64], strides = [1, 1]} : vector<2x96xf32> to vector<2x64xf32>
    %299 = vector.extract_strided_slice %297 {offsets = [0, 0], sizes = [2, 64], strides = [1, 1]} : vector<2x96xf32> to vector<2x64xf32>
    %300 = arith.addf %298, %299 : vector<2x64xf32>
    %301 = arith.negf %300 : vector<2x64xf32>
    %302 = math.exp %301 : vector<2x64xf32>
    %cst_75 = arith.constant 1.000000e+00 : f32
    %303 = vector.broadcast %cst_75 : f32 to vector<2x64xf32>
    %304 = arith.addf %303, %302 : vector<2x64xf32>
    %305 = arith.divf %303, %304 : vector<2x64xf32>
    %306 = vector.extract_strided_slice %305 {offsets = [0, 0], sizes = [2, 32], strides = [1, 1]} : vector<2x64xf32> to vector<2x32xf32>
    %307 = vector.extract_strided_slice %305 {offsets = [0, 32], sizes = [2, 32], strides = [1, 1]} : vector<2x64xf32> to vector<2x32xf32>
    %308 = vector.extract_strided_slice %296 {offsets = [0, 64], sizes = [2, 32], strides = [1, 1]} : vector<2x96xf32> to vector<2x32xf32>
    %309 = vector.extract_strided_slice %297 {offsets = [0, 64], sizes = [2, 32], strides = [1, 1]} : vector<2x96xf32> to vector<2x32xf32>
    %310 = vector.broadcast %218 : vector<1x32xf32> to vector<2x32xf32>
    %311 = arith.addf %309, %310 : vector<2x32xf32>
    %312 = arith.mulf %306, %311 : vector<2x32xf32>
    %313 = arith.addf %308, %312 : vector<2x32xf32>
    %314 = math.tanh %313 : vector<2x32xf32>
    %cst_76 = arith.constant 1.000000e+00 : f32
    %315 = vector.broadcast %cst_76 : f32 to vector<2x32xf32>
    %316 = arith.subf %315, %307 : vector<2x32xf32>
    %317 = arith.mulf %316, %314 : vector<2x32xf32>
    %318 = arith.mulf %307, %294 : vector<2x32xf32>
    %319 = arith.addf %317, %318 : vector<2x32xf32>
    %c6_77 = arith.constant 6 : index
    %c0_78 = arith.constant 0 : index
    %320 = vector.load %arg9[%c6_77, %c0_78] : memref<16x32xf32, #tpu.memory_space<vmem>>, vector<2x32xf32>
    tpu.vector_store %arg9[%c6_77, %c0_78], %319 {strides = array<i32>} : memref<16x32xf32, #tpu.memory_space<vmem>>, vector<2x32xf32>,
    %321 = vector.extract_strided_slice %214 {offsets = [8, 0], sizes = [2, 96], strides = [1, 1]} : vector<16x96xf32> to vector<2x96xf32>
    %cst_79 = arith.constant dense<0.000000e+00> : vector<2x96xf32>
    %322 = tpu.matmul %319, %216, %cst_79 {dimension_numbers = #tpu.dot_dimension_numbers<[1], [0], [0], [1], [0, 0, 1, 1], [], []>} : vector<2x32xf32>, vector<32x96xf32>, vector<2x96xf32> -> vector<2x96xf32>
    %323 = vector.extract_strided_slice %321 {offsets = [0, 0], sizes = [2, 64], strides = [1, 1]} : vector<2x96xf32> to vector<2x64xf32>
    %324 = vector.extract_strided_slice %322 {offsets = [0, 0], sizes = [2, 64], strides = [1, 1]} : vector<2x96xf32> to vector<2x64xf32>
    %325 = arith.addf %323, %324 : vector<2x64xf32>
    %326 = arith.negf %325 : vector<2x64xf32>
    %327 = math.exp %326 : vector<2x64xf32>
    %cst_80 = arith.constant 1.000000e+00 : f32
    %328 = vector.broadcast %cst_80 : f32 to vector<2x64xf32>
    %329 = arith.addf %328, %327 : vector<2x64xf32>
    %330 = arith.divf %328, %329 : vector<2x64xf32>
    %331 = vector.extract_strided_slice %330 {offsets = [0, 0], sizes = [2, 32], strides = [1, 1]} : vector<2x64xf32> to vector<2x32xf32>
    %332 = vector.extract_strided_slice %330 {offsets = [0, 32], sizes = [2, 32], strides = [1, 1]} : vector<2x64xf32> to vector<2x32xf32>
    %333 = vector.extract_strided_slice %321 {offsets = [0, 64], sizes = [2, 32], strides = [1, 1]} : vector<2x96xf32> to vector<2x32xf32>
    %334 = vector.extract_strided_slice %322 {offsets = [0, 64], sizes = [2, 32], strides = [1, 1]} : vector<2x96xf32> to vector<2x32xf32>
    %335 = vector.broadcast %218 : vector<1x32xf32> to vector<2x32xf32>
    %336 = arith.addf %334, %335 : vector<2x32xf32>
    %337 = arith.mulf %331, %336 : vector<2x32xf32>
    %338 = arith.addf %333, %337 : vector<2x32xf32>
    %339 = math.tanh %338 : vector<2x32xf32>
    %cst_81 = arith.constant 1.000000e+00 : f32
    %340 = vector.broadcast %cst_81 : f32 to vector<2x32xf32>
    %341 = arith.subf %340, %332 : vector<2x32xf32>
    %342 = arith.mulf %341, %339 : vector<2x32xf32>
    %343 = arith.mulf %332, %319 : vector<2x32xf32>
    %344 = arith.addf %342, %343 : vector<2x32xf32>
    %c8_82 = arith.constant 8 : index
    %c0_83 = arith.constant 0 : index
    %345 = vector.load %arg9[%c8_82, %c0_83] : memref<16x32xf32, #tpu.memory_space<vmem>>, vector<2x32xf32>
    tpu.vector_store %arg9[%c8_82, %c0_83], %344 {strides = array<i32>} : memref<16x32xf32, #tpu.memory_space<vmem>>, vector<2x32xf32>,
    %346 = vector.extract_strided_slice %214 {offsets = [10, 0], sizes = [2, 96], strides = [1, 1]} : vector<16x96xf32> to vector<2x96xf32>
    %cst_84 = arith.constant dense<0.000000e+00> : vector<2x96xf32>
    %347 = tpu.matmul %344, %216, %cst_84 {dimension_numbers = #tpu.dot_dimension_numbers<[1], [0], [0], [1], [0, 0, 1, 1], [], []>} : vector<2x32xf32>, vector<32x96xf32>, vector<2x96xf32> -> vector<2x96xf32>
    %348 = vector.extract_strided_slice %346 {offsets = [0, 0], sizes = [2, 64], strides = [1, 1]} : vector<2x96xf32> to vector<2x64xf32>
    %349 = vector.extract_strided_slice %347 {offsets = [0, 0], sizes = [2, 64], strides = [1, 1]} : vector<2x96xf32> to vector<2x64xf32>
    %350 = arith.addf %348, %349 : vector<2x64xf32>
    %351 = arith.negf %350 : vector<2x64xf32>
    %352 = math.exp %351 : vector<2x64xf32>
    %cst_85 = arith.constant 1.000000e+00 : f32
    %353 = vector.broadcast %cst_85 : f32 to vector<2x64xf32>
    %354 = arith.addf %353, %352 : vector<2x64xf32>
    %355 = arith.divf %353, %354 : vector<2x64xf32>
    %356 = vector.extract_strided_slice %355 {offsets = [0, 0], sizes = [2, 32], strides = [1, 1]} : vector<2x64xf32> to vector<2x32xf32>
    %357 = vector.extract_strided_slice %355 {offsets = [0, 32], sizes = [2, 32], strides = [1, 1]} : vector<2x64xf32> to vector<2x32xf32>
    %358 = vector.extract_strided_slice %346 {offsets = [0, 64], sizes = [2, 32], strides = [1, 1]} : vector<2x96xf32> to vector<2x32xf32>
    %359 = vector.extract_strided_slice %347 {offsets = [0, 64], sizes = [2, 32], strides = [1, 1]} : vector<2x96xf32> to vector<2x32xf32>
    %360 = vector.broadcast %218 : vector<1x32xf32> to vector<2x32xf32>
    %361 = arith.addf %359, %360 : vector<2x32xf32>
    %362 = arith.mulf %356, %361 : vector<2x32xf32>
    %363 = arith.addf %358, %362 : vector<2x32xf32>
    %364 = math.tanh %363 : vector<2x32xf32>
    %cst_86 = arith.constant 1.000000e+00 : f32
    %365 = vector.broadcast %cst_86 : f32 to vector<2x32xf32>
    %366 = arith.subf %365, %357 : vector<2x32xf32>
    %367 = arith.mulf %366, %364 : vector<2x32xf32>
    %368 = arith.mulf %357, %344 : vector<2x32xf32>
    %369 = arith.addf %367, %368 : vector<2x32xf32>
    %c10_87 = arith.constant 10 : index
    %c0_88 = arith.constant 0 : index
    %370 = vector.load %arg9[%c10_87, %c0_88] : memref<16x32xf32, #tpu.memory_space<vmem>>, vector<2x32xf32>
    tpu.vector_store %arg9[%c10_87, %c0_88], %369 {strides = array<i32>} : memref<16x32xf32, #tpu.memory_space<vmem>>, vector<2x32xf32>,
    %371 = vector.extract_strided_slice %214 {offsets = [12, 0], sizes = [2, 96], strides = [1, 1]} : vector<16x96xf32> to vector<2x96xf32>
    %cst_89 = arith.constant dense<0.000000e+00> : vector<2x96xf32>
    %372 = tpu.matmul %369, %216, %cst_89 {dimension_numbers = #tpu.dot_dimension_numbers<[1], [0], [0], [1], [0, 0, 1, 1], [], []>} : vector<2x32xf32>, vector<32x96xf32>, vector<2x96xf32> -> vector<2x96xf32>
    %373 = vector.extract_strided_slice %371 {offsets = [0, 0], sizes = [2, 64], strides = [1, 1]} : vector<2x96xf32> to vector<2x64xf32>
    %374 = vector.extract_strided_slice %372 {offsets = [0, 0], sizes = [2, 64], strides = [1, 1]} : vector<2x96xf32> to vector<2x64xf32>
    %375 = arith.addf %373, %374 : vector<2x64xf32>
    %376 = arith.negf %375 : vector<2x64xf32>
    %377 = math.exp %376 : vector<2x64xf32>
    %cst_90 = arith.constant 1.000000e+00 : f32
    %378 = vector.broadcast %cst_90 : f32 to vector<2x64xf32>
    %379 = arith.addf %378, %377 : vector<2x64xf32>
    %380 = arith.divf %378, %379 : vector<2x64xf32>
    %381 = vector.extract_strided_slice %380 {offsets = [0, 0], sizes = [2, 32], strides = [1, 1]} : vector<2x64xf32> to vector<2x32xf32>
    %382 = vector.extract_strided_slice %380 {offsets = [0, 32], sizes = [2, 32], strides = [1, 1]} : vector<2x64xf32> to vector<2x32xf32>
    %383 = vector.extract_strided_slice %371 {offsets = [0, 64], sizes = [2, 32], strides = [1, 1]} : vector<2x96xf32> to vector<2x32xf32>
    %384 = vector.extract_strided_slice %372 {offsets = [0, 64], sizes = [2, 32], strides = [1, 1]} : vector<2x96xf32> to vector<2x32xf32>
    %385 = vector.broadcast %218 : vector<1x32xf32> to vector<2x32xf32>
    %386 = arith.addf %384, %385 : vector<2x32xf32>
    %387 = arith.mulf %381, %386 : vector<2x32xf32>
    %388 = arith.addf %383, %387 : vector<2x32xf32>
    %389 = math.tanh %388 : vector<2x32xf32>
    %cst_91 = arith.constant 1.000000e+00 : f32
    %390 = vector.broadcast %cst_91 : f32 to vector<2x32xf32>
    %391 = arith.subf %390, %382 : vector<2x32xf32>
    %392 = arith.mulf %391, %389 : vector<2x32xf32>
    %393 = arith.mulf %382, %369 : vector<2x32xf32>
    %394 = arith.addf %392, %393 : vector<2x32xf32>
    %c12_92 = arith.constant 12 : index
    %c0_93 = arith.constant 0 : index
    %395 = vector.load %arg9[%c12_92, %c0_93] : memref<16x32xf32, #tpu.memory_space<vmem>>, vector<2x32xf32>
    tpu.vector_store %arg9[%c12_92, %c0_93], %394 {strides = array<i32>} : memref<16x32xf32, #tpu.memory_space<vmem>>, vector<2x32xf32>,
    %396 = vector.extract_strided_slice %214 {offsets = [14, 0], sizes = [2, 96], strides = [1, 1]} : vector<16x96xf32> to vector<2x96xf32>
    %cst_94 = arith.constant dense<0.000000e+00> : vector<2x96xf32>
    %397 = tpu.matmul %394, %216, %cst_94 {dimension_numbers = #tpu.dot_dimension_numbers<[1], [0], [0], [1], [0, 0, 1, 1], [], []>} : vector<2x32xf32>, vector<32x96xf32>, vector<2x96xf32> -> vector<2x96xf32>
    %398 = vector.extract_strided_slice %396 {offsets = [0, 0], sizes = [2, 64], strides = [1, 1]} : vector<2x96xf32> to vector<2x64xf32>
    %399 = vector.extract_strided_slice %397 {offsets = [0, 0], sizes = [2, 64], strides = [1, 1]} : vector<2x96xf32> to vector<2x64xf32>
    %400 = arith.addf %398, %399 : vector<2x64xf32>
    %401 = arith.negf %400 : vector<2x64xf32>
    %402 = math.exp %401 : vector<2x64xf32>
    %cst_95 = arith.constant 1.000000e+00 : f32
    %403 = vector.broadcast %cst_95 : f32 to vector<2x64xf32>
    %404 = arith.addf %403, %402 : vector<2x64xf32>
    %405 = arith.divf %403, %404 : vector<2x64xf32>
    %406 = vector.extract_strided_slice %405 {offsets = [0, 0], sizes = [2, 32], strides = [1, 1]} : vector<2x64xf32> to vector<2x32xf32>
    %407 = vector.extract_strided_slice %405 {offsets = [0, 32], sizes = [2, 32], strides = [1, 1]} : vector<2x64xf32> to vector<2x32xf32>
    %408 = vector.extract_strided_slice %396 {offsets = [0, 64], sizes = [2, 32], strides = [1, 1]} : vector<2x96xf32> to vector<2x32xf32>
    %409 = vector.extract_strided_slice %397 {offsets = [0, 64], sizes = [2, 32], strides = [1, 1]} : vector<2x96xf32> to vector<2x32xf32>
    %410 = vector.broadcast %218 : vector<1x32xf32> to vector<2x32xf32>
    %411 = arith.addf %409, %410 : vector<2x32xf32>
    %412 = arith.mulf %406, %411 : vector<2x32xf32>
    %413 = arith.addf %408, %412 : vector<2x32xf32>
    %414 = math.tanh %413 : vector<2x32xf32>
    %cst_96 = arith.constant 1.000000e+00 : f32
    %415 = vector.broadcast %cst_96 : f32 to vector<2x32xf32>
    %416 = arith.subf %415, %407 : vector<2x32xf32>
    %417 = arith.mulf %416, %414 : vector<2x32xf32>
    %418 = arith.mulf %407, %394 : vector<2x32xf32>
    %419 = arith.addf %417, %418 : vector<2x32xf32>
    %c14_97 = arith.constant 14 : index
    %c0_98 = arith.constant 0 : index
    %420 = vector.load %arg9[%c14_97, %c0_98] : memref<16x32xf32, #tpu.memory_space<vmem>>, vector<2x32xf32>
    tpu.vector_store %arg9[%c14_97, %c0_98], %419 {strides = array<i32>} : memref<16x32xf32, #tpu.memory_space<vmem>>, vector<2x32xf32>,
    %c0_99 = arith.constant 0 : index
    %c0_100 = arith.constant 0 : index
    %421 = vector.load %arg9[%c0_99, %c0_100] : memref<16x32xf32, #tpu.memory_space<vmem>>, vector<16x32xf32>
    %c0_101 = arith.constant 0 : index
    %c0_102 = arith.constant 0 : index
    %422 = vector.load %arg6[%c0_101, %c0_102] : memref<32x128xf32, #tpu.memory_space<vmem>>, vector<32x128xf32>
    %cst_103 = arith.constant dense<0.000000e+00> : vector<16x128xf32>
    %423 = tpu.matmul %421, %422, %cst_103 {dimension_numbers = #tpu.dot_dimension_numbers<[1], [0], [0], [1], [0, 0, 1, 1], [], []>} : vector<16x32xf32>, vector<32x128xf32>, vector<16x128xf32> -> vector<16x128xf32>
    %c0_104 = arith.constant 0 : index
    %c0_105 = arith.constant 0 : index
    %424 = vector.load %arg7[%c0_104, %c0_105] : memref<1x128xf32, #tpu.memory_space<vmem>>, vector<1x128xf32>
    %425 = vector.broadcast %424 : vector<1x128xf32> to vector<16x128xf32>
    %426 = arith.addf %423, %425 : vector<16x128xf32>
    %c0_106 = arith.constant 0 : index
    %c0_107 = arith.constant 0 : index
    %427 = vector.load %arg8[%c0_106, %c0_107] : memref<16x128xf32, #tpu.memory_space<vmem>>, vector<16x128xf32>
    tpu.vector_store %arg8[%c0_106, %c0_107], %426 {strides = array<i32>} : memref<16x128xf32, #tpu.memory_space<vmem>>, vector<16x128xf32>,
    return
  }
}

</mosaic_0001>

<bundles_post_ra>
// kernel: tpu_custom_call.1
= control target key start
LH: loop header
LB: loop body
LE: loop exit
PB: predicated region body
PF: predicated region fallthrough
CT: control target
= control target key end

     0   :  { %13 = vsyncpa [#allocation4], 0  ;;  %s3304_s0 = inlined_call_operand.hbm [shape: f32[16,96], index: 0, kind: input, shape index: {}]   ;;  %s3305_s1 = inlined_call_operand.hbm [shape: f32[2,2,32], index: 1, kind: input, shape index: {}]   ;;  %s3306_s2 = inlined_call_operand.hbm [shape: f32[2,32,96], index: 2, kind: input, shape index: {}]   ;;  %s3307_s3 = inlined_call_operand.hbm [shape: f32[2,32,96], index: 3, kind: input, shape index: {}]   ;;  %s3308_s4 = inlined_call_operand.vmem [shape: f32[2,1,96], index: 4, kind: input, shape index: {}]   ;;  %s3309_s5 = inlined_call_operand.vmem [shape: f32[2,1,32], index: 5, kind: input, shape index: {}]   ;;  %s3310_s6 = inlined_call_operand.hbm [shape: f32[32,128], index: 6, kind: input, shape index: {}]   ;;  %s3311_s7 = inlined_call_operand.vmem [shape: f32[1,128], index: 7, kind: input, shape index: {}]   ;;  %s3312_s8 = inlined_call_operand.hbm [shape: f32[16,128], index: 8, kind: output, shape index: {}]  }
   0x1   :  { %14 = vsyncpa [#allocation7], 0 }
   0x2   :  { %15 = vsyncpa [#allocation10], 0 }
   0x3   :  { %16 = vsyncpa [#allocation5], 0  ;;  %s2818_s27 = smov [#allocation6]   ;;  %s2678_s9 = scalar_lea.hbm %s3305_s1, 64 }
   0x4   :  { %s34_s28 = sshll.u32 %s2818_s27, 4  ;;  %p2679_p0 = scmp.ne.s32.totalorder %s3305_s1, %s2678_s9  ;;  %s35_s28 = int_to_ptr.vmem [resolvable:$true] %s34_s28 }
   0x5   :  { %p2682_p1 = scmp.lt.u32.totalorder %s2678_s9, %s3305_s1 }
   0x7   :  { %p2684_p2 = pnand %p2682_p1, %p2679_p0 }
   0x9   :  { %2687 = shalt.err (!%p2684_p2)
}
   0xa   :  { %s2688_s14 = scalar_lea.vmem %s35_s28, 64  ;;  %p2693_p4 = scmp.lt.s32.totalorder %s35_s28, %s35_s28 }
   0xb   :  { %p2689_p3 = scmp.ne.s32.totalorder %s35_s28, %s2688_s14  ;;  %p2694_p5 = scmp.lt.s32.totalorder %s2688_s14, %s2688_s14 }
   0xd   :  { %p2695_p6 = por %p2694_p5, %p2693_p4 }
   0xf   :  { %p2696_p7 = pnand %p2695_p6, %p2689_p3 }
  0x11   :  { %2699 = shalt.err (!%p2696_p7)
}
  0x12   :  { %s2819_s15 = smov 32   ;;  %s2820_s16 = smov 2  }
  0x13   :  { %40 = dma.hbm_to_vmem [thread:$0]  %s3305_s1, 64, %s35_s28, [#allocation7], %s2819_s15, %s2819_s15, %s2820_s16  }
  0x14   :  { %s2821_s19 = smov [#allocation9]   ;;  %s2822_s21 = smov [#allocation3]  }
  0x15   :  { %s58_s20 = sshll.u32 %s2821_s19, 4  ;;  %s22_s22 = sshll.u32 %s2822_s21, 4  ;;  %s59_s20 = int_to_ptr.vmem [resolvable:$true] %s58_s20  ;;  %s23_s22 = int_to_ptr.vmem [resolvable:$true] %s22_s22 }
  0x16   :  { %s2700_s25 = scalar_lea.hbm %s3307_s3, 1024 }
  0x17   :  { %p2701_p8 = scmp.ne.s32.totalorder %s3307_s3, %s2700_s25  ;;  %p2704_p9 = scmp.lt.u32.totalorder %s2700_s25, %s3307_s3 }
  0x19   :  { %p2706_p10 = pnand %p2704_p9, %p2701_p8 }
  0x1b   :  { %2709 = shalt.err (!%p2706_p10)
}
  0x1c   :  { %s2710_s1 = scalar_lea.vmem %s59_s20, 1024  ;;  %p2715_p12 = scmp.lt.s32.totalorder %s59_s20, %s59_s20 }
  0x1d   :  { %p2711_p11 = scmp.ne.s32.totalorder %s59_s20, %s2710_s1  ;;  %p2716_p13 = scmp.lt.s32.totalorder %s2710_s1, %s2710_s1 }
  0x1f   :  { %p2717_p0 = por %p2716_p13, %p2715_p12 }
  0x21   :  { %p2718_p1 = pnand %p2717_p0, %p2711_p11 }
  0x23   :  { %2721 = shalt.err (!%p2718_p1)
}
  0x24   :  { %s2823_s28 = smov 128   ;;  %s2824_s9 = smov 8  }
  0x25   :  { %64 = dma.hbm_to_vmem [thread:$0]  %s3307_s3, 1024, %s59_s20, [#allocation10], %s2823_s28, %s2823_s28, %s2824_s9  }
  0x26   :  { %s2722_s14 = scalar_lea.hbm %s3304_s0, 256 }
  0x27   :  { %p2723_p2 = scmp.ne.s32.totalorder %s3304_s0, %s2722_s14  ;;  %p2726_p3 = scmp.lt.u32.totalorder %s2722_s14, %s3304_s0 }
  0x29   :  { %p2728_p4 = pnand %p2726_p3, %p2723_p2 }
  0x2b   :  { %2731 = shalt.err (!%p2728_p4)
}
  0x2c   :  { %s2732_s21 = scalar_lea.vmem %s23_s22, 256  ;;  %p2737_p6 = scmp.lt.s32.totalorder %s23_s22, %s23_s22 }
  0x2d   :  { %p2733_p5 = scmp.ne.s32.totalorder %s23_s22, %s2732_s21  ;;  %p2738_p7 = scmp.lt.s32.totalorder %s2732_s21, %s2732_s21 }
  0x2f   :  { %p2739_p8 = por %p2738_p7, %p2737_p6 }
  0x31   :  { %p2740_p9 = pnand %p2739_p8, %p2733_p5 }
  0x33   :  { %2743 = shalt.err (!%p2740_p9)
}
  0x34   :  { %28 = dma.hbm_to_vmem [thread:$0]  %s3304_s0, 256, %s23_s22, [#allocation4], %s2823_s28, %s2823_s28, %s2824_s9  }
  0x35   :  { %s2825_s23 = smov [#allocation8]   ;;  %s2826_s25 = smov [#allocation11]  }
  0x36   :  { %s46_s24 = sshll.u32 %s2825_s23, 4  ;;  %s74_s26 = sshll.u32 %s2826_s25, 4  ;;  %s47_s24 = int_to_ptr.vmem [resolvable:$true] %s46_s24  ;;  %s75_s26 = int_to_ptr.vmem [resolvable:$true] %s74_s26 }
  0x37   :  { %s2744_s30 = scalar_lea.hbm %s3306_s2, 1024 }
  0x38   :  { %p2745_p10 = scmp.ne.s32.totalorder %s3306_s2, %s2744_s30  ;;  %p2748_p11 = scmp.lt.u32.totalorder %s2744_s30, %s3306_s2 }
  0x3a   :  { %p2750_p12 = pnand %p2748_p11, %p2745_p10 }
  0x3c   :  { %2753 = shalt.err (!%p2750_p12)
}
  0x3d   :  { %s2754_s0 = scalar_lea.vmem %s47_s24, 1024  ;;  %p2759_p0 = scmp.lt.s32.totalorder %s47_s24, %s47_s24 }
  0x3e   :  { %p2755_p13 = scmp.ne.s32.totalorder %s47_s24, %s2754_s0  ;;  %p2760_p1 = scmp.lt.s32.totalorder %s2754_s0, %s2754_s0 }
  0x40   :  { %p2761_p2 = por %p2760_p1, %p2759_p0 }
  0x42   :  { %p2762_p3 = pnand %p2761_p2, %p2755_p13 }
  0x44   :  { %2765 = shalt.err (!%p2762_p3)
}
  0x45   :  { %52 = dma.hbm_to_vmem [thread:$0]  %s3306_s2, 1024, %s47_s24, [#allocation7], %s2823_s28, %s2823_s28, %s2824_s9  }
  0x46   :  { %s2766_s17 = scalar_lea.hbm %s3310_s6, 512 }
  0x47   :  { %p2767_p4 = scmp.ne.s32.totalorder %s3310_s6, %s2766_s17  ;;  %p2770_p5 = scmp.lt.u32.totalorder %s2766_s17, %s3310_s6 }
  0x49   :  { %p2772_p6 = pnand %p2770_p5, %p2767_p4 }
  0x4b   :  { %2775 = shalt.err (!%p2772_p6)
}
  0x4c   :  { %s2776_s20 = scalar_lea.vmem %s75_s26, 512  ;;  %p2781_p8 = scmp.lt.s32.totalorder %s75_s26, %s75_s26 }
  0x4d   :  { %p2777_p7 = scmp.ne.s32.totalorder %s75_s26, %s2776_s20  ;;  %p2782_p9 = scmp.lt.s32.totalorder %s2776_s20, %s2776_s20 }
  0x4f   :  { %p2783_p10 = por %p2782_p9, %p2781_p8 }
  0x51   :  { %p2784_p11 = pnand %p2783_p10, %p2777_p7 }
  0x53   :  { %2787 = shalt.err (!%p2784_p11)
}
  0x54   :  { %80 = dma.hbm_to_vmem [thread:$0]  %s3310_s6, 512, %s75_s26, [#allocation10], %s2823_s28, %s2823_s28, %s2824_s9  }
  0x55   :  { %2810 = dma.done.wait [#allocation4], 256  }
  0x56   :  { %2811 = vsyncadd [#allocation4], 4294967040 }
  0x57   :  { %2812 = dma.done.wait [#allocation7], 1088  }
  0x58   :  { %2813 = vsyncadd [#allocation7], 4294966208 }
  0x59   :  { %2814 = dma.done.wait [#allocation10], 1536  }
  0x5a   :  { %2815 = vsyncadd [#allocation10], 4294965760  ;;  %v2827_v0 = vmov 0.0|0.0   ;;  %vm2828_vm0 = vmmov 0   ;;  %v2829_v1 = vmov 0.0   ;;  %v100_v2 = vld [vmem:[#allocation9] sm:$0xff] }
  0x5b   :  { %2455 = vmatprep.subr.bf16.mxu0 %v2827_v0  ;;  %2265 = vmatprep.mubr.msk.f32.mxu0 %vm2828_vm0, %v2829_v1  ;;  %v101_v3 = vld [vmem:[#allocation9 + $0x8] sm:$0xff]  ;;  %v102_v4 = vld [vmem:[#allocation9 + $0x10] sm:$0xff]  ;;  %v103_v6 = vld [vmem:[#allocation9 + $0x18] sm:$0xff]  ;;  %s2830_s25 = smov 64   ;;  %vm106_vm1 = vcmask 261120   ;;  %s2831_s26 = smov 96  }
  0x5c   :  { %2461 = vmatprep.subr.bf16.mxu1 %v2827_v0  ;;  %2276 = vmatprep.mubr.msk.f32.mxu1 %vm2828_vm0, %v2829_v1  ;;  %v2958_v5 = vpack.c.bf16 %v101_v3, %v100_v2  ;;  %v2125_v7 = vld [vmem:[%s3309_s5] ss:$0 sm:$0xff]  ;;  %v2965_v8 = vpack.c.bf16 %v103_v6, %v102_v4  ;;  %v2986_v14 = vld [vmem:[#allocation3] sm:$0xff]  ;;  %vm222_vm2 = vcmask 254976   ;;  %vm333_vm3 = vcmask 257026   ;;  %s2832_s1 = smov [#allocation12]  }
  0x5d   :  { %192 = vrot.lane.b32.xlu0 %v2125_v7, %s2830_s25  ;;  %v105_v9 = vld [vmem:[#allocation6] sm:$0x3]  ;;  %vm561_vm4 = vcmask 261126   ;;  %vm447_vm5 = vcmask 259076   ;;  %s2109_s10 = sshll.u32 %s2832_s1, 4  ;;  %s2110_s10 = int_to_ptr.vmem [resolvable:$true] %s2109_s10 }
  0x5e   :  { %2457 = vmatpush3.bf16.msra.mxu0 %v2958_v5  ;;  %2463 = vmatpush3.bf16.msra.mxu1 %v2958_v5  ;;  %s2788_s11 = scalar_lea.vmem %s2110_s10, 256  ;;  %p2793_p13 = scmp.lt.s32.totalorder %s2110_s10, %s2110_s10 }
  0x5f   :  { %2458 = vmatprep.subr.bf16.mxu0 %v2827_v0  ;;  %2464 = vmatprep.subr.bf16.mxu1 %v2827_v0  ;;  %p2789_p12 = scmp.ne.s32.totalorder %s2110_s10, %s2788_s11  ;;  %p2794_p0 = scmp.lt.s32.totalorder %s2788_s11, %s2788_s11 }
  0x61   :  { %p2795_p1 = por %p2794_p0, %p2793_p13 }
  0x62   :  { %2460 = vmatpush3.bf16.msra.mxu0 %v2965_v8  ;;  %2466 = vmatpush3.bf16.msra.mxu1 %v2965_v8 }
  0x63   :  { %2467 = vmatprep.subr.bf16.mxu0 %v2827_v0  ;;  %2473 = vmatprep.subr.bf16.mxu1 %v2827_v0  ;;  %p2796_p2 = pnand %p2795_p1, %p2789_p12 }
  0x65   :  { %2266 = vmatmul.mubr.msk.f32.vlgmr.msra.gmra.mrb[0].mxu0 %vm106_vm1, %v105_v9 }
  0x66   :  { %2469 = vmatpush3.bf16.msra.mxu0 %v2958_v5  ;;  %2287 = vmatprep.mubr.msk.f32.mxu0 %vm2828_vm0, %v2829_v1 }
  0x67   :  { %2470 = vmatprep.subr.bf16.mxu0 %v2827_v0 }
  0x6a   :  { %2472 = vmatpush3.bf16.msra.mxu0 %v2965_v8 }
  0x6b   :  { %2479 = vmatprep.subr.bf16.mxu0 %v2827_v0 }
  0xcf   :  { %v2981_v10 = vpop.permute.xlu0 %192 }
 0x138   :  { %v176_v11 = vpop.f32.mrb[0].mxu0 }
 0x139   :  { %v195_v12 = vadd.f32 %v2981_v10, %v176_v11  ;;  %v2267_v13 = vpop.f32.mrb[1].mxu0  ;;  %v180_v15 = vadd.f32 %v176_v11, %v2986_v14 }
 0x13b   :  { %197 = vrot.lane.b32.xlu0 %v195_v12, %s2830_s25  ;;  %v2124_v16 = vmul.f32 -1.442695, %v180_v15 }
 0x13d   :  { %2582 = vpow2.f32 %v2124_v16 }
 0x13f   :  { %213 = vrot.lane.b32.xlu0 %v105_v9, %s2819_s15 }
 0x147   :  { %v2583_v17 = vpop.eup %2582 }
 0x148   :  { %v184_v18 = vadd.f32 1.0, %v2583_v17 }
 0x14a   :  { %2584 = vrcp.f32 %v184_v18 }
 0x154   :  { %v2585_v19 = vpop.eup %2584 }
 0x155   :  { %v207_v26 = vsub.f32 1.0, %v2585_v19 }
 0x1ad   :  { %v198_v20 = vpop.permute.xlu0 %197 }
 0x1ae   :  { %v200_v21 = vmul.f32 %v2585_v19, %v198_v20 }
 0x1b0   :  { %202 = vrot.lane.b32.xlu1 %v200_v21, %s2830_s25 }
 0x1b1   :  { %v214_v25 = vpop.permute.xlu0 %213 }
 0x1b2   :  { %v216_v28 = vmul.f32 %v2585_v19, %v214_v25 }
 0x222   :  { %v203_v22 = vpop.permute.xlu1 %202 }
 0x223   :  { %v205_v23 = vadd.f32 %v203_v22, %v2986_v14 }
 0x225   :  { %2586 = vtanh.f32 %v205_v23 }
 0x22f   :  { %v2587_v24 = vpop.eup %2586 }
 0x230   :  { %209 = vrot.lane.b32.xlu1 %v2587_v24, %s2831_s26 }
 0x2a2   :  { %v210_v27 = vpop.permute.xlu1 %209 }
 0x2a3   :  { %v212_v29 = vmul.f32 %v210_v27, %v207_v26 }
 0x2a5   :  { %v217_v30 = vadd.f32 %v216_v28, %v212_v29 }
 0x2a7   :  { %219 = vrot.lane.b32.xlu1 %v217_v30, %s2831_s26  ;;  %v325_v47 = vrot.slane %v217_v30, 6 }
 0x319   :  { %v220_v31 = vpop.permute.xlu1 %219 }
 0x31a   :  { %223 = vst.msk [vmem:[#allocation2] sm:$0x3] %vm222_vm2, %v220_v31  ;;  %2277 = vmatmul.mubr.msk.f32.vlgmr.msra.gmra.mrb[0].mxu1 %vm106_vm1, %v220_v31 }
 0x31b   :  { %2475 = vmatpush3.bf16.msra.mxu1 %v2958_v5  ;;  %2298 = vmatprep.mubr.msk.f32.mxu1 %vm2828_vm0, %v2829_v1 }
 0x31c   :  { %2476 = vmatprep.subr.bf16.mxu1 %v2827_v0 }
 0x31f   :  { %2478 = vmatpush3.bf16.msra.mxu1 %v2965_v8 }
 0x320   :  { %2485 = vmatprep.subr.bf16.mxu1 %v2827_v0 }
 0x3ed   :  { %v292_v32 = vpop.f32.mrb[0].mxu1 }
 0x3ee   :  { %v306_v33 = vadd.f32 %v292_v32, %v2981_v10  ;;  %v2278_v34 = vpop.f32.mrb[1].mxu1  ;;  %v297_v36 = vrot.slane %v292_v32, 6 }
 0x3f0   :  { %v308_v35 = vrot.slane %v306_v33, 6  ;;  %v299_v37 = vadd.f32 %v297_v36, %v2986_v14 }
 0x3f2   :  { %309 = vrot.lane.b32.xlu0 %v308_v35, %s2830_s25  ;;  %v2127_v38 = vmul.f32 -1.442695, %v299_v37 }
 0x3f4   :  { %2588 = vpow2.f32 %v2127_v38 }
 0x3fe   :  { %v2589_v39 = vpop.eup %2588 }
 0x3ff   :  { %v303_v40 = vadd.f32 1.0, %v2589_v39 }
 0x401   :  { %2590 = vrcp.f32 %v303_v40 }
 0x40b   :  { %v2591_v41 = vpop.eup %2590 }
 0x40c   :  { %v319_v48 = vsub.f32 1.0, %v2591_v41  ;;  %v327_v51 = vmul.f32 %v2591_v41, %v325_v47 }
 0x464   :  { %v310_v42 = vpop.permute.xlu0 %309 }
 0x465   :  { %v312_v43 = vmul.f32 %v2591_v41, %v310_v42 }
 0x467   :  { %314 = vrot.lane.b32.xlu1 %v312_v43, %s2830_s25 }
 0x4d9   :  { %v315_v44 = vpop.permute.xlu1 %314 }
 0x4da   :  { %v317_v45 = vadd.f32 %v315_v44, %v2986_v14 }
 0x4dc   :  { %2592 = vtanh.f32 %v317_v45  ;;  %v3055_v45 = vld [vmem:[#allocation3 + $0x8] sm:$0xff] }
 0x4e6   :  { %v2593_v46 = vpop.eup %2592 }
 0x4e7   :  { %321 = vrot.lane.b32.xlu0 %v2593_v46, %s2831_s26 }
 0x559   :  { %v322_v49 = vpop.permute.xlu0 %321 }
 0x55a   :  { %v324_v50 = vmul.f32 %v322_v49, %v319_v48 }
 0x55c   :  { %v3007_v52 = vadd.f32 %v327_v51, %v324_v50 }
 0x55e   :  { %v335_v53 = vrot.slane %v3007_v52, 2  ;;  %v439_v12 = vrot.slane %v3007_v52, 6 }
 0x560   :  { %336 = vrot.lane.b32.xlu1 %v335_v53, %s2831_s26 }
 0x5d2   :  { %v337_v54 = vpop.permute.xlu1 %336 }
 0x5d3   :  { %2288 = vmatmul.mubr.msk.f32.vlgmr.msra.gmra.mrb[2].mxu0 %vm106_vm1, %v337_v54 }
 0x5d4   :  { %2481 = vmatpush3.bf16.msra.mxu0 %v2958_v5  ;;  %2309 = vmatprep.mubr.msk.f32.mxu0 %vm2828_vm0, %v2829_v1 }
 0x5d5   :  { %2482 = vmatprep.subr.bf16.mxu0 %v2827_v0 }
 0x5d8   :  { %2484 = vmatpush3.bf16.msra.mxu0 %v2965_v8 }
 0x5d9   :  { %2491 = vmatprep.subr.bf16.mxu0 %v2827_v0 }
 0x6a6   :  { %v406_v55 = vpop.f32.mrb[2].mxu0 }
 0x6a7   :  { %v420_v56 = vadd.f32 %v406_v55, %v2981_v10  ;;  %v2289_v57 = vpop.f32.mrb[3].mxu0  ;;  %v411_v59 = vrot.slane %v406_v55, 4 }
 0x6a9   :  { %v422_v58 = vrot.slane %v420_v56, 4  ;;  %v413_v60 = vadd.f32 %v411_v59, %v2986_v14 }
 0x6ab   :  { %423 = vrot.lane.b32.xlu0 %v422_v58, %s2830_s25  ;;  %v2129_v61 = vmul.f32 -1.442695, %v413_v60 }
 0x6ad   :  { %2594 = vpow2.f32 %v2129_v61 }
 0x6b7   :  { %v2595_v62 = vpop.eup %2594 }
 0x6b8   :  { %v417_v63 = vadd.f32 1.0, %v2595_v62 }
 0x6ba   :  { %2596 = vrcp.f32 %v417_v63 }
 0x6c4   :  { %v2597_v2 = vpop.eup %2596 }
 0x6c5   :  { %v433_v11 = vsub.f32 1.0, %v2597_v2  ;;  %v441_v15 = vmul.f32 %v2597_v2, %v439_v12 }
 0x71d   :  { %v424_v3 = vpop.permute.xlu0 %423 }
 0x71e   :  { %v426_v4 = vmul.f32 %v2597_v2, %v424_v3 }
 0x720   :  { %428 = vrot.lane.b32.xlu1 %v426_v4, %s2830_s25 }
 0x792   :  { %v429_v6 = vpop.permute.xlu1 %428 }
 0x793   :  { %v431_v7 = vadd.f32 %v429_v6, %v2986_v14 }
 0x795   :  { %2598 = vtanh.f32 %v431_v7 }
 0x79f   :  { %v2599_v9 = vpop.eup %2598 }
 0x7a0   :  { %435 = vrot.lane.b32.xlu0 %v2599_v9, %s2831_s26 }
 0x812   :  { %v436_v13 = vpop.permute.xlu0 %435 }
 0x813   :  { %v438_v16 = vmul.f32 %v436_v13, %v433_v11 }
 0x815   :  { %v3025_v17 = vadd.f32 %v441_v15, %v438_v16 }
 0x817   :  { %v449_v18 = vrot.slane %v3025_v17, 4  ;;  %v553_v36 = vrot.slane %v3025_v17, 6 }
 0x819   :  { %450 = vrot.lane.b32.xlu1 %v449_v18, %s2831_s26 }
 0x88b   :  { %v451_v19 = vpop.permute.xlu1 %450 }
 0x88c   :  { %2299 = vmatmul.mubr.msk.f32.vlgmr.msra.gmra.mrb[2].mxu1 %vm106_vm1, %v451_v19 }
 0x88d   :  { %2487 = vmatpush3.bf16.msra.mxu1 %v2958_v5  ;;  %2320 = vmatprep.mubr.msk.f32.mxu1 %vm2828_vm0, %v2829_v1 }
 0x88e   :  { %2488 = vmatprep.subr.bf16.mxu1 %v2827_v0 }
 0x891   :  { %2490 = vmatpush3.bf16.msra.mxu1 %v2965_v8 }
 0x892   :  { %2497 = vmatprep.subr.bf16.mxu1 %v2827_v0 }
 0x95f   :  { %v520_v20 = vpop.f32.mrb[2].mxu1 }
 0x960   :  { %v534_v21 = vadd.f32 %v520_v20, %v2981_v10  ;;  %v2300_v22 = vpop.f32.mrb[3].mxu1  ;;  %v525_v24 = vrot.slane %v520_v20, 2 }
 0x962   :  { %v536_v23 = vrot.slane %v534_v21, 2  ;;  %v527_v25 = vadd.f32 %v525_v24, %v2986_v14 }
 0x964   :  { %537 = vrot.lane.b32.xlu0 %v536_v23, %s2830_s25  ;;  %v2131_v26 = vmul.f32 -1.442695, %v527_v25 }
 0x966   :  { %2600 = vpow2.f32 %v2131_v26 }
 0x970   :  { %v2601_v27 = vpop.eup %2600 }
 0x971   :  { %v531_v28 = vadd.f32 1.0, %v2601_v27 }
 0x973   :  { %2602 = vrcp.f32 %v531_v28 }
 0x97d   :  { %v2603_v29 = vpop.eup %2602 }
 0x97e   :  { %v547_v35 = vsub.f32 1.0, %v2603_v29  ;;  %v555_v38 = vmul.f32 %v2603_v29, %v553_v36 }
 0x9d6   :  { %v538_v30 = vpop.permute.xlu0 %537 }
 0x9d7   :  { %v540_v31 = vmul.f32 %v2603_v29, %v538_v30 }
 0x9d9   :  { %542 = vrot.lane.b32.xlu1 %v540_v31, %s2830_s25 }
 0xa4b   :  { %v543_v32 = vpop.permute.xlu1 %542 }
 0xa4c   :  { %v545_v33 = vadd.f32 %v543_v32, %v2986_v14 }
 0xa4e   :  { %2604 = vtanh.f32 %v545_v33 }
 0xa58   :  { %v2605_v34 = vpop.eup %2604 }
 0xa59   :  { %549 = vrot.lane.b32.xlu0 %v2605_v34, %s2831_s26 }
 0xacb   :  { %v550_v37 = vpop.permute.xlu0 %549 }
 0xacc   :  { %v552_v39 = vmul.f32 %v550_v37, %v547_v35 }
 0xace   :  { %v3043_v40 = vadd.f32 %v555_v38, %v552_v39 }
 0xad0   :  { %v563_v41 = vrot.slane %v3043_v40, 6 }
 0xad2   :  { %564 = vrot.lane.b32.xlu1 %v563_v41, %s2831_s26 }
 0xb44   :  { %v565_v42 = vpop.permute.xlu1 %564 }
 0xb45   :  { %2310 = vmatmul.mubr.msk.f32.vlgmr.msra.gmra.mrb[4].mxu0 %vm106_vm1, %v565_v42 }
 0xb46   :  { %2493 = vmatpush3.bf16.msra.mxu0 %v2958_v5  ;;  %2331 = vmatprep.mubr.msk.f32.mxu0 %vm2828_vm0, %v2829_v1 }
 0xb47   :  { %2494 = vmatprep.subr.bf16.mxu0 %v2827_v0 }
 0xb4a   :  { %2496 = vmatpush3.bf16.msra.mxu0 %v2965_v8 }
 0xc18   :  { %v634_v14 = vpop.f32.mrb[4].mxu0 }
 0xc19   :  { %v645_v43 = vadd.f32 %v634_v14, %v2981_v10  ;;  %v2311_v44 = vpop.f32.mrb[5].mxu0  ;;  %v638_v46 = vadd.f32 %v634_v14, %v3055_v45 }
 0xc1b   :  { %647 = vrot.lane.b32.xlu0 %v645_v43, %s2830_s25  ;;  %v2133_v47 = vmul.f32 -1.442695, %v638_v46 }
 0xc1d   :  { %2606 = vpow2.f32 %v2133_v47 }
 0xc27   :  { %v2607_v48 = vpop.eup %2606 }
 0xc28   :  { %v642_v49 = vadd.f32 1.0, %v2607_v48 }
 0xc2a   :  { %2608 = vrcp.f32 %v642_v49 }
 0xc34   :  { %v2609_v50 = vpop.eup %2608 }
 0xc35   :  { %v657_v57 = vsub.f32 1.0, %v2609_v50  ;;  %v664_v59 = vmul.f32 %v2609_v50, %v563_v41 }
 0xc8d   :  { %v648_v51 = vpop.permute.xlu0 %647 }
 0xc8e   :  { %v650_v53 = vmul.f32 %v2609_v50, %v648_v51 }
 0xc90   :  { %652 = vrot.lane.b32.xlu1 %v650_v53, %s2830_s25 }
 0xd02   :  { %v653_v54 = vpop.permute.xlu1 %652 }
 0xd03   :  { %v655_v55 = vadd.f32 %v653_v54, %v3055_v45 }
 0xd05   :  { %2610 = vtanh.f32 %v655_v55 }
 0xd0f   :  { %v2611_v56 = vpop.eup %2610 }
 0xd10   :  { %659 = vrot.lane.b32.xlu0 %v2611_v56, %s2831_s26 }
 0xd82   :  { %v660_v58 = vpop.permute.xlu0 %659 }
 0xd83   :  { %v662_v60 = vmul.f32 %v660_v58, %v657_v57 }
 0xd85   :  { %v665_v61 = vadd.f32 %v664_v59, %v662_v60 }
 0xd87   :  { %667 = vrot.lane.b32.xlu1 %v665_v61, %s2831_s26  ;;  %v772_v19 = vrot.slane %v665_v61, 6 }
 0xdf9   :  { %v668_v62 = vpop.permute.xlu1 %667 }
 0xdfa   :  { %670 = vst.msk [vmem:[#allocation2 + $0x8] sm:$0x3] %vm222_vm2, %v668_v62  ;;  %2321 = vmatmul.mubr.msk.f32.vlgmr.msra.gmra.mrb[4].mxu1 %vm106_vm1, %v668_v62 }
 0xdfb   :  { %2499 = vmatpush3.bf16.msra.mxu1 %v2958_v5  ;;  %2342 = vmatprep.mubr.msk.f32.mxu1 %vm2828_vm0, %v2829_v1 }
 0xdfc   :  { %2500 = vmatprep.subr.bf16.mxu1 %v2827_v0 }
 0xdff   :  { %2502 = vmatpush3.bf16.msra.mxu1 %v2965_v8 }
 0xe00   :  { %2511 = vmatprep.subr.bf16.mxu1 %v2827_v0 }
 0xecd   :  { %v739_v63 = vpop.f32.mrb[4].mxu1 }
 0xece   :  { %v753_v2 = vadd.f32 %v739_v63, %v2981_v10  ;;  %v2322_v3 = vpop.f32.mrb[5].mxu1  ;;  %v744_v6 = vrot.slane %v739_v63, 6 }
 0xed0   :  { %v755_v4 = vrot.slane %v753_v2, 6  ;;  %v746_v7 = vadd.f32 %v744_v6, %v3055_v45 }
 0xed2   :  { %756 = vrot.lane.b32.xlu0 %v755_v4, %s2830_s25  ;;  %v2135_v5 = vmul.f32 -1.442695, %v746_v7  ;;  %v1105_v7 = vld [vmem:[#allocation9 + $0x28] sm:$0xff] }
 0xed4   :  { %2612 = vpow2.f32 %v2135_v5  ;;  %v1106_v5 = vld [vmem:[#allocation9 + $0x30] sm:$0xff] }
 0xede   :  { %v2613_v9 = vpop.eup %2612 }
 0xedf   :  { %v750_v11 = vadd.f32 1.0, %v2613_v9  ;;  %v1107_v9 = vld [vmem:[#allocation9 + $0x38] sm:$0xff] }
 0xee1   :  { %2614 = vrcp.f32 %v750_v11  ;;  %v3113_v11 = vpack.c.bf16 %v1107_v9, %v1106_v5 }
 0xeeb   :  { %v2615_v12 = vpop.eup %2614 }
 0xeec   :  { %v766_v20 = vsub.f32 1.0, %v2615_v12  ;;  %v774_v23 = vmul.f32 %v2615_v12, %v772_v19 }
 0xf44   :  { %v757_v13 = vpop.permute.xlu0 %756 }
 0xf45   :  { %v759_v8 = vmul.f32 %v2615_v12, %v757_v13  ;;  %v3119_v12 = vld [vmem:[#allocation6 + $0x2] sm:$0x3]  ;;  %v1011_v13 = vld [vmem:[#allocation8 + $0x28] sm:$0xff] }
 0xf47   :  { %761 = vrot.lane.b32.xlu1 %v759_v8, %s2830_s25 }
 0xfb9   :  { %v762_v15 = vpop.permute.xlu1 %761 }
 0xfba   :  { %v764_v16 = vadd.f32 %v762_v15, %v3055_v45  ;;  %v1012_v15 = vld [vmem:[#allocation8 + $0x30] sm:$0xff] }
 0xfbc   :  { %2616 = vtanh.f32 %v764_v16  ;;  %v1013_v16 = vld [vmem:[#allocation8 + $0x38] sm:$0xff] }
 0xfc6   :  { %v2617_v18 = vpop.eup %2616 }
 0xfc7   :  { %768 = vrot.lane.b32.xlu0 %v2617_v18, %s2831_s26  ;;  %v2507_v18 = vpack.c.bf16 %v1013_v16, %v1012_v15 }
0x1039   :  { %v769_v21 = vpop.permute.xlu0 %768 }
0x103a   :  { %v771_v22 = vmul.f32 %v769_v21, %v766_v20 }
0x103c   :  { %v3076_v24 = vadd.f32 %v774_v23, %v771_v22  ;;  %v2147_v22 = vld [vmem:[%s3309_s5 + $0x1] ss:$0 sm:$0xff] }
0x103e   :  { %v781_v25 = vrot.slane %v3076_v24, 2  ;;  %v885_v43 = vrot.slane %v3076_v24, 6 }
0x1040   :  { %782 = vrot.lane.b32.xlu1 %v781_v25, %s2831_s26 }
0x10b2   :  { %v783_v26 = vpop.permute.xlu1 %782 }
0x10b3   :  { %2332 = vmatmul.mubr.msk.f32.vlgmr.msra.gmra.mrb[6].mxu0 %vm106_vm1, %v783_v26 }
0x1186   :  { %v852_v27 = vpop.f32.mrb[6].mxu0 }
0x1187   :  { %v866_v28 = vadd.f32 %v852_v27, %v2981_v10  ;;  %v2333_v29 = vpop.f32.mrb[7].mxu0  ;;  %v857_v31 = vrot.slane %v852_v27, 4 }
0x1189   :  { %v868_v30 = vrot.slane %v866_v28, 4  ;;  %v859_v32 = vadd.f32 %v857_v31, %v3055_v45 }
0x118b   :  { %869 = vrot.lane.b32.xlu0 %v868_v30, %s2830_s25  ;;  %v2137_v33 = vmul.f32 -1.442695, %v859_v32 }
0x118d   :  { %2618 = vpow2.f32 %v2137_v33 }
0x1197   :  { %v2619_v34 = vpop.eup %2618 }
0x1198   :  { %v863_v35 = vadd.f32 1.0, %v2619_v34 }
0x119a   :  { %2620 = vrcp.f32 %v863_v35  ;;  %v2141_v35 = vld [vmem:[%s3308_s4 + $0x1] ss:$0 sm:$0xff] }
0x11a4   :  { %v2621_v36 = vpop.eup %2620 }
0x11a5   :  { %v879_v14 = vsub.f32 1.0, %v2621_v36  ;;  %v887_v46 = vmul.f32 %v2621_v36, %v885_v43 }
0x11fd   :  { %v870_v37 = vpop.permute.xlu0 %869 }
0x11fe   :  { %v872_v38 = vmul.f32 %v2621_v36, %v870_v37 }
0x1200   :  { %874 = vrot.lane.b32.xlu1 %v872_v38, %s2830_s25 }
0x1272   :  { %v875_v39 = vpop.permute.xlu1 %874 }
0x1273   :  { %v877_v41 = vadd.f32 %v875_v39, %v3055_v45 }
0x1275   :  { %2622 = vtanh.f32 %v877_v41 }
0x127f   :  { %v2623_v42 = vpop.eup %2622 }
0x1280   :  { %881 = vrot.lane.b32.xlu0 %v2623_v42, %s2831_s26 }
0x12f2   :  { %v882_v44 = vpop.permute.xlu0 %881 }
0x12f3   :  { %v884_v47 = vmul.f32 %v882_v44, %v879_v14 }
0x12f5   :  { %v3088_v48 = vadd.f32 %v887_v46, %v884_v47 }
0x12f7   :  { %v894_v49 = vrot.slane %v3088_v48, 4  ;;  %v998_v20 = vrot.slane %v3088_v48, 6 }
0x12f9   :  { %895 = vrot.lane.b32.xlu1 %v894_v49, %s2831_s26 }
0x136b   :  { %v896_v50 = vpop.permute.xlu1 %895 }
0x136c   :  { %2343 = vmatmul.mubr.msk.f32.vlgmr.msra.gmra.mrb[6].mxu1 %vm106_vm1, %v896_v50 }
0x136d   :  { %2364 = vmatprep.mubr.msk.f32.mxu1 %vm2828_vm0, %v2829_v1 }
0x143f   :  { %v965_v51 = vpop.f32.mrb[6].mxu1 }
0x1440   :  { %v979_v53 = vadd.f32 %v965_v51, %v2981_v10  ;;  %v2344_v54 = vpop.f32.mrb[7].mxu1  ;;  %v970_v56 = vrot.slane %v965_v51, 2 }
0x1442   :  { %v981_v55 = vrot.slane %v979_v53, 2  ;;  %v972_v57 = vadd.f32 %v970_v56, %v3055_v45 }
0x1444   :  { %982 = vrot.lane.b32.xlu0 %v981_v55, %s2830_s25  ;;  %v2139_v58 = vmul.f32 -1.442695, %v972_v57 }
0x1446   :  { %2624 = vpow2.f32 %v2139_v58 }
0x1450   :  { %v2625_v59 = vpop.eup %2624 }
0x1451   :  { %v976_v60 = vadd.f32 1.0, %v2625_v59 }
0x1453   :  { %2626 = vrcp.f32 %v976_v60 }
0x145d   :  { %v2627_v61 = vpop.eup %2626 }
0x145e   :  { %v992_v19 = vsub.f32 1.0, %v2627_v61  ;;  %v1000_v23 = vmul.f32 %v2627_v61, %v998_v20 }
0x14b6   :  { %v983_v62 = vpop.permute.xlu0 %982 }
0x14b7   :  { %v985_v63 = vmul.f32 %v2627_v61, %v983_v62 }
0x14b9   :  { %987 = vrot.lane.b32.xlu1 %v985_v63, %s2830_s25 }
0x14bd   :  { %330 = vrot.lane.b32.xlu1 %v3007_v52, %s2831_s26 }
0x14c1   :  { %558 = vrot.lane.b32.xlu1 %v3043_v40, %s2831_s26  ;;  %v1104_v40 = vld [vmem:[#allocation9 + $0x20] sm:$0xff] }
0x14c5   :  { %890 = vrot.lane.b32.xlu1 %v3088_v48, %s2831_s26 }
0x14c9   :  { %1197 = vrot.lane.b32.xlu1 %v2147_v22, %s2830_s25 }
0x152b   :  { %v988_v10 = vpop.permute.xlu1 %987 }
0x152c   :  { %v990_v2 = vadd.f32 %v988_v10, %v3055_v45  ;;  %v3110_v45 = vpack.c.bf16 %v1105_v7, %v1104_v40 }
0x152e   :  { %2628 = vtanh.f32 %v990_v2  ;;  %2513 = vmatpush3.bf16.msra.mxu1 %v3110_v45 }
0x152f   :  { %v331_v3 = vpop.permute.xlu1 %330  ;;  %2514 = vmatprep.subr.bf16.mxu1 %v2827_v0 }
0x1530   :  { %334 = vst.msk [vmem:[#allocation2] sm:$0xc] %vm333_vm3, %v331_v3 }
0x1532   :  { %2516 = vmatpush3.bf16.msra.mxu1 %v3113_v11 }
0x1533   :  { %v559_v4 = vpop.permute.xlu1 %558  ;;  %2523 = vmatprep.subr.bf16.mxu1 %v2827_v0 }
0x1534   :  { %562 = vst.msk [vmem:[#allocation2] sm:$0xc0] %vm561_vm4, %v559_v4 }
0x1535   :  { %2365 = vmatmul.mubr.msk.f32.vlgmr.msra.gmra.mrb[8].mxu1 %vm106_vm1, %v3119_v12 }
0x1536   :  { %2525 = vmatpush3.bf16.msra.mxu1 %v3110_v45  ;;  %2386 = vmatprep.mubr.msk.f32.mxu1 %vm2828_vm0, %v2829_v1 }
0x1537   :  { %v891_v52 = vpop.permute.xlu1 %890  ;;  %2526 = vmatprep.subr.bf16.mxu1 %v2827_v0 }
0x1538   :  { %v2629_v6 = vpop.eup %2628  ;;  %893 = vst.msk [vmem:[#allocation2 + $0x8] sm:$0x30] %vm447_vm5, %v891_v52 }
0x1539   :  { %994 = vrot.lane.b32.xlu0 %v2629_v6, %s2831_s26 }
0x153a   :  { %2528 = vmatpush3.bf16.msra.mxu1 %v3113_v11 }
0x153b   :  { %2535 = vmatprep.subr.bf16.mxu1 %v2827_v0  ;;  %v3142_v31 = vpop.permute.xlu1 %1197 }
0x153d   :  { %444 = vrot.lane.b32.xlu0 %v3025_v17, %s2831_s26  ;;  %v1010_v17 = vld [vmem:[#allocation8 + $0x20] sm:$0xff] }
0x153e   :  { %v2503_v8 = vpack.c.bf16 %v1011_v13, %v1010_v17 }
0x1540   :  { %2504 = vmatprep.subr.bf16.mxu0 %v2503_v8 }
0x1541   :  { %777 = vrot.lane.b32.xlu0 %v3076_v24, %s2831_s26  ;;  %2506 = vmatpush3.bf16.msra.mxu0 %v2503_v8 }
0x1542   :  { %2508 = vmatprep.subr.bf16.mxu0 %v2507_v18 }
0x1545   :  { %2510 = vmatpush3.bf16.msra.mxu0 %v2507_v18 }
0x1546   :  { %2517 = vmatprep.subr.bf16.mxu0 %v2827_v0 }
0x15ab   :  { %v995_v21 = vpop.permute.xlu0 %994 }
0x15ac   :  { %v997_v24 = vmul.f32 %v995_v21, %v992_v19 }
0x15ae   :  { %v1001_v25 = vadd.f32 %v1000_v23, %v997_v24 }
0x15af   :  { %v445_v26 = vpop.permute.xlu0 %444 }
0x15b0   :  { %448 = vst.msk [vmem:[#allocation2] sm:$0x30] %vm447_vm5, %v445_v26  ;;  %1003 = vrot.lane.b32.xlu0 %v1001_v25, %s2831_s26 }
0x15b3   :  { %v778_v27 = vpop.permute.xlu0 %777 }
0x15b4   :  { %780 = vst.msk [vmem:[#allocation2 + $0x8] sm:$0xc] %vm333_vm3, %v778_v27 }
0x15b7   :  { %v1007_v28 = vld [vmem:[#allocation2] sm:$0xff] }
0x15b8   :  { %2353 = vmatprep.mubr.msk.f32.mxu0 %vm106_vm1, %v1007_v28 }
0x1608   :  { %v1181_v29 = vpop.f32.mrb[8].mxu1 }
0x1609   :  { %v2366_v30 = vpop.f32.mrb[9].mxu1  ;;  %v1200_v32 = vadd.f32 %v3142_v31, %v1181_v29 }
0x160b   :  { %1202 = vrot.lane.b32.xlu0 %v1200_v32, %s2830_s25 }
0x1622   :  { %v1004_v33 = vpop.permute.xlu0 %1003 }
0x1623   :  { %1006 = vst.msk [vmem:[#allocation2 + $0x8] sm:$0xc0] %vm561_vm4, %v1004_v33 }
0x162a   :  { %v1008_v34 = vld [vmem:[#allocation2 + $0x8] sm:$0xff] }
0x162b   :  { %2354 = vmatmul.mubr.msk.f32.vlgmr.msra.gmra.mrb[8].mxu0 %vm106_vm1, %v1008_v34 }
0x162c   :  { %2519 = vmatpush3.bf16.msra.mxu0 %v3110_v45  ;;  %2375 = vmatprep.mubr.msk.f32.mxu0 %vm2828_vm0, %v2829_v1 }
0x162d   :  { %2520 = vmatprep.subr.bf16.mxu0 %v2827_v0 }
0x1630   :  { %2522 = vmatpush3.bf16.msra.mxu0 %v3113_v11 }
0x1631   :  { %2529 = vmatprep.subr.bf16.mxu0 %v2827_v0 }
0x167d   :  { %v1203_v44 = vpop.permute.xlu0 %1202 }
0x16fe   :  { %v2355_v36 = vpop.f32.mrb[8].mxu0 }
0x16ff   :  { %v3157_v37 = vadd.f32 %v2355_v36, %v2141_v35  ;;  %v1094_v38 = vpop.f32.mrb[9].mxu0 }
0x1700   :  { %v3159_v39 = vadd.f32 %v2141_v35, %v1094_v38 }
0x1702   :  { %v1185_v41 = vadd.f32 %v1181_v29, %v3159_v39 }
0x1704   :  { %v2146_v42 = vmul.f32 -1.442695, %v1185_v41 }
0x1706   :  { %2630 = vpow2.f32 %v2146_v42 }
0x1710   :  { %v2631_v14 = vpop.eup %2630 }
0x1711   :  { %v1189_v43 = vadd.f32 1.0, %v2631_v14 }
0x1713   :  { %2632 = vrcp.f32 %v1189_v43 }
0x171d   :  { %v2633_v46 = vpop.eup %2632 }
0x171e   :  { %v1205_v47 = vmul.f32 %v2633_v46, %v1203_v44  ;;  %v1212_v53 = vsub.f32 1.0, %v2633_v46 }
0x1720   :  { %1207 = vrot.lane.b32.xlu1 %v1205_v47, %s2830_s25 }
0x1724   :  { %1218 = vrot.lane.b32.xlu1 %v3119_v12, %s2819_s15 }
0x1792   :  { %v1208_v48 = vpop.permute.xlu1 %1207 }
0x1793   :  { %v1210_v49 = vadd.f32 %v1208_v48, %v3159_v39 }
0x1795   :  { %2634 = vtanh.f32 %v1210_v49 }
0x1796   :  { %v1219_v51 = vpop.permute.xlu1 %1218 }
0x1797   :  { %v1221_v55 = vmul.f32 %v2633_v46, %v1219_v51 }
0x179f   :  { %v2635_v50 = vpop.eup %2634 }
0x17a0   :  { %1214 = vrot.lane.b32.xlu0 %v2635_v50, %s2831_s26 }
0x1812   :  { %v1215_v54 = vpop.permute.xlu0 %1214 }
0x1813   :  { %v1217_v56 = vmul.f32 %v1215_v54, %v1212_v53 }
0x1815   :  { %v1222_v57 = vadd.f32 %v1221_v55, %v1217_v56 }
0x1817   :  { %1224 = vrot.lane.b32.xlu0 %v1222_v57, %s2831_s26  ;;  %v1329_v12 = vrot.slane %v1222_v57, 6 }
0x1889   :  { %v1225_v58 = vpop.permute.xlu0 %1224 }
0x188a   :  { %1227 = vst.msk [vmem:[#allocation2] sm:$0x3] %vm222_vm2, %v1225_v58  ;;  %2376 = vmatmul.mubr.msk.f32.vlgmr.msra.gmra.mrb[10].mxu0 %vm106_vm1, %v1225_v58 }
0x188b   :  { %2531 = vmatpush3.bf16.msra.mxu0 %v3110_v45  ;;  %2397 = vmatprep.mubr.msk.f32.mxu0 %vm2828_vm0, %v2829_v1 }
0x188c   :  { %2532 = vmatprep.subr.bf16.mxu0 %v2827_v0 }
0x188f   :  { %2534 = vmatpush3.bf16.msra.mxu0 %v3113_v11 }
0x1890   :  { %2541 = vmatprep.subr.bf16.mxu0 %v2827_v0 }
0x195d   :  { %v1296_v59 = vpop.f32.mrb[10].mxu0 }
0x195e   :  { %v1310_v60 = vadd.f32 %v1296_v59, %v3142_v31  ;;  %v2377_v61 = vpop.f32.mrb[11].mxu0  ;;  %v1301_v63 = vrot.slane %v1296_v59, 6 }
0x1960   :  { %v1312_v62 = vrot.slane %v1310_v60, 6  ;;  %v1303_v10 = vadd.f32 %v1301_v63, %v3159_v39 }
0x1962   :  { %1313 = vrot.lane.b32.xlu1 %v1312_v62, %s2830_s25  ;;  %v2149_v2 = vmul.f32 -1.442695, %v1303_v10 }
0x1964   :  { %2636 = vpow2.f32 %v2149_v2 }
0x196e   :  { %v2637_v3 = vpop.eup %2636 }
0x196f   :  { %v1307_v4 = vadd.f32 1.0, %v2637_v3 }
0x1971   :  { %2638 = vrcp.f32 %v1307_v4 }
0x197b   :  { %v2639_v52 = vpop.eup %2638 }
0x197c   :  { %v1323_v17 = vsub.f32 1.0, %v2639_v52  ;;  %v1331_v15 = vmul.f32 %v2639_v52, %v1329_v12 }
0x19d4   :  { %v1314_v6 = vpop.permute.xlu1 %1313 }
0x19d5   :  { %v1316_v40 = vmul.f32 %v2639_v52, %v1314_v6 }
0x19d7   :  { %1318 = vrot.lane.b32.xlu0 %v1316_v40, %s2830_s25 }
0x1a49   :  { %v1319_v7 = vpop.permute.xlu0 %1318 }
0x1a4a   :  { %v1321_v5 = vadd.f32 %v1319_v7, %v3159_v39 }
0x1a4c   :  { %2640 = vtanh.f32 %v1321_v5 }
0x1a56   :  { %v2641_v9 = vpop.eup %2640 }
0x1a57   :  { %1325 = vrot.lane.b32.xlu1 %v2641_v9, %s2831_s26 }
0x1ac9   :  { %v1326_v13 = vpop.permute.xlu1 %1325 }
0x1aca   :  { %v1328_v8 = vmul.f32 %v1326_v13, %v1323_v17 }
0x1acc   :  { %v3182_v16 = vadd.f32 %v1331_v15, %v1328_v8 }
0x1ace   :  { %v1338_v18 = vrot.slane %v3182_v16, 2  ;;  %v1442_v38 = vrot.slane %v3182_v16, 6 }
0x1ad0   :  { %1339 = vrot.lane.b32.xlu0 %v1338_v18, %s2831_s26 }
0x1b42   :  { %v1340_v19 = vpop.permute.xlu0 %1339 }
0x1b43   :  { %2387 = vmatmul.mubr.msk.f32.vlgmr.msra.gmra.mrb[10].mxu1 %vm106_vm1, %v1340_v19 }
0x1b44   :  { %2537 = vmatpush3.bf16.msra.mxu1 %v3110_v45  ;;  %2408 = vmatprep.mubr.msk.f32.mxu1 %vm2828_vm0, %v2829_v1 }
0x1b45   :  { %2538 = vmatprep.subr.bf16.mxu1 %v2827_v0 }
0x1b48   :  { %2540 = vmatpush3.bf16.msra.mxu1 %v3113_v11 }
0x1b49   :  { %2547 = vmatprep.subr.bf16.mxu1 %v2827_v0 }
0x1c16   :  { %v1409_v20 = vpop.f32.mrb[10].mxu1 }
0x1c17   :  { %v1423_v21 = vadd.f32 %v1409_v20, %v3142_v31  ;;  %v2388_v22 = vpop.f32.mrb[11].mxu1  ;;  %v1414_v24 = vrot.slane %v1409_v20, 4 }
0x1c19   :  { %v1425_v23 = vrot.slane %v1423_v21, 4  ;;  %v1416_v25 = vadd.f32 %v1414_v24, %v3159_v39 }
0x1c1b   :  { %1426 = vrot.lane.b32.xlu1 %v1425_v23, %s2830_s25  ;;  %v2151_v26 = vmul.f32 -1.442695, %v1416_v25 }
0x1c1d   :  { %2642 = vpow2.f32 %v2151_v26 }
0x1c27   :  { %v2643_v27 = vpop.eup %2642 }
0x1c28   :  { %v1420_v28 = vadd.f32 1.0, %v2643_v27 }
0x1c2a   :  { %2644 = vrcp.f32 %v1420_v28 }
0x1c34   :  { %v2645_v29 = vpop.eup %2644 }
0x1c35   :  { %v1436_v36 = vsub.f32 1.0, %v2645_v29  ;;  %v1444_v42 = vmul.f32 %v2645_v29, %v1442_v38 }
0x1c8d   :  { %v1427_v30 = vpop.permute.xlu1 %1426 }
0x1c8e   :  { %v1429_v32 = vmul.f32 %v2645_v29, %v1427_v30 }
0x1c90   :  { %1431 = vrot.lane.b32.xlu0 %v1429_v32, %s2830_s25 }
0x1d02   :  { %v1432_v33 = vpop.permute.xlu0 %1431 }
0x1d03   :  { %v1434_v34 = vadd.f32 %v1432_v33, %v3159_v39 }
0x1d05   :  { %2646 = vtanh.f32 %v1434_v34 }
0x1d0f   :  { %v2647_v35 = vpop.eup %2646 }
0x1d10   :  { %1438 = vrot.lane.b32.xlu1 %v2647_v35, %s2831_s26 }
0x1d82   :  { %v1439_v41 = vpop.permute.xlu1 %1438 }
0x1d83   :  { %v1441_v14 = vmul.f32 %v1439_v41, %v1436_v36 }
0x1d85   :  { %v3200_v43 = vadd.f32 %v1444_v42, %v1441_v14 }
0x1d87   :  { %v1451_v44 = vrot.slane %v3200_v43, 4  ;;  %v1555_v10 = vrot.slane %v3200_v43, 6 }
0x1d89   :  { %1452 = vrot.lane.b32.xlu0 %v1451_v44, %s2831_s26 }
0x1dfb   :  { %v1453_v46 = vpop.permute.xlu0 %1452 }
0x1dfc   :  { %2398 = vmatmul.mubr.msk.f32.vlgmr.msra.gmra.mrb[12].mxu0 %vm106_vm1, %v1453_v46 }
0x1dfd   :  { %2543 = vmatpush3.bf16.msra.mxu0 %v3110_v45  ;;  %2419 = vmatprep.mubr.msk.f32.mxu0 %vm2828_vm0, %v2829_v1 }
0x1dfe   :  { %2544 = vmatprep.subr.bf16.mxu0 %v2827_v0 }
0x1e01   :  { %2546 = vmatpush3.bf16.msra.mxu0 %v3113_v11 }
0x1e02   :  { %2553 = vmatprep.subr.bf16.mxu0 %v2827_v0 }
0x1ecf   :  { %v1522_v47 = vpop.f32.mrb[12].mxu0 }
0x1ed0   :  { %v1536_v48 = vadd.f32 %v1522_v47, %v3142_v31  ;;  %v2399_v49 = vpop.f32.mrb[13].mxu0  ;;  %v1527_v51 = vrot.slane %v1522_v47, 2 }
0x1ed2   :  { %v1538_v50 = vrot.slane %v1536_v48, 2  ;;  %v1529_v53 = vadd.f32 %v1527_v51, %v3159_v39 }
0x1ed4   :  { %1539 = vrot.lane.b32.xlu1 %v1538_v50, %s2830_s25  ;;  %v2153_v54 = vmul.f32 -1.442695, %v1529_v53 }
0x1ed6   :  { %2648 = vpow2.f32 %v2153_v54 }
0x1ee0   :  { %v2649_v55 = vpop.eup %2648 }
0x1ee1   :  { %v1533_v56 = vadd.f32 1.0, %v2649_v55 }
0x1ee3   :  { %2650 = vrcp.f32 %v1533_v56 }
0x1eed   :  { %v2651_v57 = vpop.eup %2650 }
0x1eee   :  { %v1549_v63 = vsub.f32 1.0, %v2651_v57  ;;  %v1557_v3 = vmul.f32 %v2651_v57, %v1555_v10 }
0x1f46   :  { %v1540_v58 = vpop.permute.xlu1 %1539 }
0x1f47   :  { %v1542_v59 = vmul.f32 %v2651_v57, %v1540_v58 }
0x1f49   :  { %1544 = vrot.lane.b32.xlu0 %v1542_v59, %s2830_s25 }
0x1fbb   :  { %v1545_v60 = vpop.permute.xlu0 %1544 }
0x1fbc   :  { %v1547_v61 = vadd.f32 %v1545_v60, %v3159_v39 }
0x1fbe   :  { %2652 = vtanh.f32 %v1547_v61 }
0x1fc8   :  { %v2653_v62 = vpop.eup %2652 }
0x1fc9   :  { %1551 = vrot.lane.b32.xlu1 %v2653_v62, %s2831_s26 }
0x203b   :  { %v1552_v2 = vpop.permute.xlu1 %1551 }
0x203c   :  { %v1554_v4 = vmul.f32 %v1552_v2, %v1549_v63 }
0x203e   :  { %v3218_v52 = vadd.f32 %v1557_v3, %v1554_v4 }
0x2040   :  { %v1564_v6 = vrot.slane %v3218_v52, 6 }
0x2042   :  { %1565 = vrot.lane.b32.xlu0 %v1564_v6, %s2831_s26 }
0x20b4   :  { %v1566_v40 = vpop.permute.xlu0 %1565 }
0x20b5   :  { %2409 = vmatmul.mubr.msk.f32.vlgmr.msra.gmra.mrb[12].mxu1 %vm106_vm1, %v1566_v40 }
0x20b6   :  { %2549 = vmatpush3.bf16.msra.mxu1 %v3110_v45  ;;  %2430 = vmatprep.mubr.msk.f32.mxu1 %vm2828_vm0, %v2829_v1 }
0x20b7   :  { %2550 = vmatprep.subr.bf16.mxu1 %v2827_v0 }
0x20ba   :  { %2552 = vmatpush3.bf16.msra.mxu1 %v3113_v11 }
0x2188   :  { %v1635_v39 = vpop.f32.mrb[12].mxu1 }
0x2189   :  { %v1646_v7 = vadd.f32 %v1635_v39, %v3142_v31  ;;  %v2410_v5 = vpop.f32.mrb[13].mxu1  ;;  %v1639_v9 = vadd.f32 %v1635_v39, %v3157_v37 }
0x218b   :  { %1648 = vrot.lane.b32.xlu1 %v1646_v7, %s2830_s25  ;;  %v2155_v12 = vmul.f32 -1.442695, %v1639_v9 }
0x218d   :  { %2654 = vpow2.f32 %v2155_v12 }
0x2197   :  { %v2655_v17 = vpop.eup %2654 }
0x2198   :  { %v1643_v13 = vadd.f32 1.0, %v2655_v17 }
0x219a   :  { %2656 = vrcp.f32 %v1643_v13 }
0x21a4   :  { %v2657_v8 = vpop.eup %2656 }
0x21a5   :  { %v1658_v22 = vsub.f32 1.0, %v2657_v8  ;;  %v1665_v24 = vmul.f32 %v2657_v8, %v1564_v6 }
0x21fd   :  { %v1649_v15 = vpop.permute.xlu1 %1648 }
0x21fe   :  { %v1651_v18 = vmul.f32 %v2657_v8, %v1649_v15 }
0x2200   :  { %1653 = vrot.lane.b32.xlu0 %v1651_v18, %s2830_s25 }
0x2272   :  { %v1654_v19 = vpop.permute.xlu0 %1653 }
0x2273   :  { %v1656_v20 = vadd.f32 %v1654_v19, %v3157_v37 }
0x2275   :  { %2658 = vtanh.f32 %v1656_v20 }
0x227f   :  { %v2659_v21 = vpop.eup %2658 }
0x2280   :  { %1660 = vrot.lane.b32.xlu1 %v2659_v21, %s2831_s26 }
0x22f2   :  { %v1661_v23 = vpop.permute.xlu1 %1660 }
0x22f3   :  { %v1663_v25 = vmul.f32 %v1661_v23, %v1658_v22 }
0x22f5   :  { %v1666_v26 = vadd.f32 %v1665_v24, %v1663_v25 }
0x22f7   :  { %1668 = vrot.lane.b32.xlu0 %v1666_v26, %s2831_s26  ;;  %v1773_v14 = vrot.slane %v1666_v26, 6 }
0x2369   :  { %v1669_v27 = vpop.permute.xlu0 %1668 }
0x236a   :  { %1671 = vst.msk [vmem:[#allocation2 + $0x8] sm:$0x3] %vm222_vm2, %v1669_v27  ;;  %2420 = vmatmul.mubr.msk.f32.vlgmr.msra.gmra.mrb[14].mxu0 %vm106_vm1, %v1669_v27 }
0x236b   :  { %2555 = vmatpush3.bf16.msra.mxu0 %v3110_v45  ;;  %2441 = vmatprep.mubr.msk.f32.mxu0 %vm2828_vm0, %v2829_v1 }
0x236c   :  { %2556 = vmatprep.subr.bf16.mxu0 %v2827_v0 }
0x236f   :  { %2558 = vmatpush3.bf16.msra.mxu0 %v3113_v11 }
0x243d   :  { %v1740_v28 = vpop.f32.mrb[14].mxu0 }
0x243e   :  { %v1754_v29 = vadd.f32 %v1740_v28, %v3142_v31  ;;  %v2421_v30 = vpop.f32.mrb[15].mxu0  ;;  %v1745_v33 = vrot.slane %v1740_v28, 6 }
0x2440   :  { %v1756_v32 = vrot.slane %v1754_v29, 6  ;;  %v1747_v34 = vadd.f32 %v1745_v33, %v3157_v37  ;;  %v2012_v33 = vld [vmem:[#allocation11 + $0x10] sm:$0xff] }
0x2442   :  { %1757 = vrot.lane.b32.xlu1 %v1756_v32, %s2830_s25  ;;  %v2157_v35 = vmul.f32 -1.442695, %v1747_v34  ;;  %v2013_v34 = vld [vmem:[#allocation11 + $0x18] sm:$0xff] }
0x2444   :  { %2660 = vpow2.f32 %v2157_v35  ;;  %v2563_v35 = vpack.c.bf16 %v2013_v34, %v2012_v33 }
0x244e   :  { %v2661_v45 = vpop.eup %2660 }
0x244f   :  { %v1751_v36 = vadd.f32 1.0, %v2661_v45 }
0x2451   :  { %2662 = vrcp.f32 %v1751_v36 }
0x245b   :  { %v2663_v1 = vpop.eup %2662 }
0x245c   :  { %v1767_v44 = vsub.f32 1.0, %v2663_v1  ;;  %v1775_v48 = vmul.f32 %v2663_v1, %v1773_v14 }
0x24b4   :  { %v1758_v38 = vpop.permute.xlu1 %1757 }
0x24b5   :  { %v1760_v0 = vmul.f32 %v2663_v1, %v1758_v38 }
0x24b7   :  { %1762 = vrot.lane.b32.xlu0 %v1760_v0, %s2830_s25 }
0x2529   :  { %v1763_v11 = vpop.permute.xlu0 %1762 }
0x252a   :  { %v1765_v41 = vadd.f32 %v1763_v11, %v3157_v37 }
0x252c   :  { %2664 = vtanh.f32 %v1765_v41 }
0x2536   :  { %v2665_v42 = vpop.eup %2664 }
0x2537   :  { %1769 = vrot.lane.b32.xlu1 %v2665_v42, %s2831_s26 }
0x25a9   :  { %v1770_v46 = vpop.permute.xlu1 %1769 }
0x25aa   :  { %v1772_v47 = vmul.f32 %v1770_v46, %v1767_v44  ;;  %v2162_v46 = vld [vmem:[%s3311_s7] ss:$0 sm:$0xff] }
0x25ac   :  { %v3248_v49 = vadd.f32 %v1775_v48, %v1772_v47 }
0x25ae   :  { %v1782_v50 = vrot.slane %v3248_v49, 2  ;;  %v1886_v40 = vrot.slane %v3248_v49, 6 }
0x25b0   :  { %1783 = vrot.lane.b32.xlu0 %v1782_v50, %s2831_s26 }
0x2622   :  { %v1784_v51 = vpop.permute.xlu0 %1783 }
0x2623   :  { %2431 = vmatmul.mubr.msk.f32.vlgmr.msra.gmra.mrb[14].mxu1 %vm106_vm1, %v1784_v51 }
0x26f6   :  { %v1853_v53 = vpop.f32.mrb[14].mxu1 }
0x26f7   :  { %v1867_v54 = vadd.f32 %v1853_v53, %v3142_v31  ;;  %v2432_v55 = vpop.f32.mrb[15].mxu1  ;;  %v1858_v57 = vrot.slane %v1853_v53, 4 }
0x26f9   :  { %v1869_v56 = vrot.slane %v1867_v54, 4  ;;  %v1860_v58 = vadd.f32 %v1858_v57, %v3157_v37 }
0x26fb   :  { %1870 = vrot.lane.b32.xlu1 %v1869_v56, %s2830_s25  ;;  %v2159_v59 = vmul.f32 -1.442695, %v1860_v58 }
0x26fd   :  { %2666 = vpow2.f32 %v2159_v59 }
0x2707   :  { %v2667_v60 = vpop.eup %2666 }
0x2708   :  { %v1864_v61 = vadd.f32 1.0, %v2667_v60 }
0x270a   :  { %2668 = vrcp.f32 %v1864_v61 }
0x2714   :  { %v2669_v62 = vpop.eup %2668 }
0x2715   :  { %v1880_v6 = vsub.f32 1.0, %v2669_v62  ;;  %v1888_v7 = vmul.f32 %v2669_v62, %v1886_v40 }
0x276d   :  { %v1871_v63 = vpop.permute.xlu1 %1870 }
0x276e   :  { %v1873_v10 = vmul.f32 %v2669_v62, %v1871_v63 }
0x2770   :  { %1875 = vrot.lane.b32.xlu0 %v1873_v10, %s2830_s25 }
0x27e2   :  { %v1876_v2 = vpop.permute.xlu0 %1875 }
0x27e3   :  { %v1878_v3 = vadd.f32 %v1876_v2, %v3157_v37 }
0x27e5   :  { %2670 = vtanh.f32 %v1878_v3 }
0x27ef   :  { %v2671_v4 = vpop.eup %2670 }
0x27f0   :  { %1882 = vrot.lane.b32.xlu1 %v2671_v4, %s2831_s26 }
0x2862   :  { %v1883_v39 = vpop.permute.xlu1 %1882 }
0x2863   :  { %v1885_v5 = vmul.f32 %v1883_v39, %v1880_v6 }
0x2865   :  { %v1889_v9 = vadd.f32 %v1888_v7, %v1885_v5 }
0x2867   :  { %v1895_v12 = vrot.slane %v1889_v9, 4  ;;  %v1999_v36 = vrot.slane %v1889_v9, 6 }
0x2869   :  { %1896 = vrot.lane.b32.xlu0 %v1895_v12, %s2831_s26 }
0x28db   :  { %v1897_v17 = vpop.permute.xlu0 %1896 }
0x28dc   :  { %2442 = vmatmul.mubr.msk.f32.vlgmr.msra.gmra.mrb[16].mxu0 %vm106_vm1, %v1897_v17 }
0x29af   :  { %v1966_v13 = vpop.f32.mrb[16].mxu0 }
0x29b0   :  { %v1980_v8 = vadd.f32 %v1966_v13, %v3142_v31  ;;  %v2443_v15 = vpop.f32.mrb[17].mxu0  ;;  %v1971_v19 = vrot.slane %v1966_v13, 2 }
0x29b2   :  { %v1982_v18 = vrot.slane %v1980_v8, 2  ;;  %v1973_v20 = vadd.f32 %v1971_v19, %v3157_v37 }
0x29b4   :  { %1983 = vrot.lane.b32.xlu1 %v1982_v18, %s2830_s25  ;;  %v2161_v21 = vmul.f32 -1.442695, %v1973_v20 }
0x29b6   :  { %2672 = vpow2.f32 %v2161_v21 }
0x29c0   :  { %v2673_v22 = vpop.eup %2672 }
0x29c1   :  { %v1977_v23 = vadd.f32 1.0, %v2673_v22 }
0x29c3   :  { %2674 = vrcp.f32 %v1977_v23 }
0x29cd   :  { %v2675_v24 = vpop.eup %2674 }
0x29ce   :  { %v1993_v45 = vsub.f32 1.0, %v2675_v24  ;;  %v2001_v38 = vmul.f32 %v2675_v24, %v1999_v36 }
0x2a26   :  { %v1984_v25 = vpop.permute.xlu1 %1983 }
0x2a27   :  { %v1986_v26 = vmul.f32 %v2675_v24, %v1984_v25 }
0x2a29   :  { %1988 = vrot.lane.b32.xlu0 %v1986_v26, %s2830_s25 }
0x2a2d   :  { %1334 = vrot.lane.b32.xlu0 %v3182_v16, %s2831_s26  ;;  %v2011_v16 = vld [vmem:[#allocation11 + $0x8] sm:$0xff] }
0x2a31   :  { %1560 = vrot.lane.b32.xlu0 %v3218_v52, %s2831_s26 }
0x2a35   :  { %1891 = vrot.lane.b32.xlu0 %v1889_v9, %s2831_s26 }
0x2a9b   :  { %v1989_v31 = vpop.permute.xlu0 %1988 }
0x2a9c   :  { %v1991_v27 = vadd.f32 %v1989_v31, %v3157_v37  ;;  %v2010_v37 = vld [vmem:[#allocation11] sm:$0xff] }
0x2a9d   :  { %v2559_v52 = vpack.c.bf16 %v2011_v16, %v2010_v37 }
0x2a9e   :  { %2676 = vtanh.f32 %v1991_v27 }
0x2a9f   :  { %v1335_v28 = vpop.permute.xlu0 %1334  ;;  %2560 = vmatprep.subr.bf16.mxu1 %v2559_v52 }
0x2aa0   :  { %1337 = vst.msk [vmem:[#allocation2] sm:$0xc] %vm333_vm3, %v1335_v28  ;;  %2562 = vmatpush3.bf16.msra.mxu1 %v2559_v52 }
0x2aa1   :  { %2564 = vmatprep.subr.bf16.mxu1 %v2563_v35 }
0x2aa3   :  { %v1561_v29 = vpop.permute.xlu0 %1560 }
0x2aa4   :  { %1563 = vst.msk [vmem:[#allocation2] sm:$0xc0] %vm561_vm4, %v1561_v29  ;;  %2566 = vmatpush3.bf16.msra.mxu1 %v2563_v35 }
0x2aa7   :  { %v1892_v30 = vpop.permute.xlu0 %1891 }
0x2aa8   :  { %v2677_v32 = vpop.eup %2676  ;;  %1894 = vst.msk [vmem:[#allocation2 + $0x8] sm:$0x30] %vm447_vm5, %v1892_v30 }
0x2aa9   :  { %1995 = vrot.lane.b32.xlu1 %v2677_v32, %s2831_s26 }
0x2aad   :  { %1447 = vrot.lane.b32.xlu1 %v3200_v43, %s2831_s26 }
0x2ab1   :  { %1778 = vrot.lane.b32.xlu1 %v3248_v49, %s2831_s26 }
0x2b1b   :  { %v1996_v1 = vpop.permute.xlu1 %1995 }
0x2b1c   :  { %v1998_v0 = vmul.f32 %v1996_v1, %v1993_v45 }
0x2b1e   :  { %v2002_v11 = vadd.f32 %v2001_v38, %v1998_v0 }
0x2b1f   :  { %v1448_v43 = vpop.permute.xlu1 %1447 }
0x2b20   :  { %1450 = vst.msk [vmem:[#allocation2] sm:$0x30] %vm447_vm5, %v1448_v43  ;;  %2004 = vrot.lane.b32.xlu1 %v2002_v11, %s2831_s26 }
0x2b23   :  { %v1779_v41 = vpop.permute.xlu1 %1778 }
0x2b24   :  { %1781 = vst.msk [vmem:[#allocation2 + $0x8] sm:$0xc] %vm333_vm3, %v1779_v41 }
0x2b27   :  { %v2008_v42 = vld [vmem:[#allocation2] sm:$0xff] }
0x2b28   :  { %2452 = vmatprep.mubr.msk.f32.mxu1 %vm106_vm1, %v2008_v42 }
0x2b92   :  { %v2005_v14 = vpop.permute.xlu1 %2004 }
0x2b93   :  { %2007 = vst.msk [vmem:[#allocation2 + $0x8] sm:$0xc0] %vm561_vm4, %v2005_v14 }
0x2b9a   :  { %v2009_v44 = vld [vmem:[#allocation2 + $0x8] sm:$0xff] }
0x2b9b   :  { %2453 = vmatmul.mubr.msk.f32.vlgmr.msra.gmra.mrb[16].mxu1 %vm106_vm1, %v2009_v44 }
0x2c6e   :  { %v2454_v47 = vpop.f32.mrb[16].mxu1 }
0x2c6f   :  { %v2099_v48 = vadd.f32 %v2454_v47, %v2162_v46  ;;  %v2093_v49 = vpop.f32.mrb[17].mxu1 }
0x2c70   :  { %v2094_v50 = vadd.f32 %v2162_v46, %v2093_v49 }
0x2c71   :  { %2103 = vst [vmem:[#allocation12 + $0x8] sm:$0xff] %v2099_v48 }
0x2c72   :  { %2102 = vst [vmem:[#allocation12] sm:$0xff] %v2094_v50 }
0x2c73   :  { %2799 = shalt.err (!%p2796_p2)
}
0x2c74   :  { %s2800_s7 = scalar_lea.hbm %s3312_s8, 256 }
0x2c75   :  { %p2801_p3 = scmp.ne.s32.totalorder %s3312_s8, %s2800_s7  ;;  %p2804_p4 = scmp.lt.u32.totalorder %s2800_s7, %s3312_s8 }
0x2c77   :  { %p2806_p5 = pnand %p2804_p4, %p2801_p3 }
0x2c79   :  { %2809 = shalt.err (!%p2806_p5)
}
0x2c7a   :  { %2115 = dma.vmem_to_hbm [thread:$0]  %s2110_s10, 256, %s3312_s8, [#allocation5], %s2823_s28, %s2823_s28, %s2824_s9  }
0x2c7b   :  { %2816 = dma.done.wait [#allocation5], 256  }
0x2c7c   :  { %2817 = vsyncadd [#allocation5], 4294967040 }
0x2c7d   :  { %2119 = vsyncpa [#allocation4], 1 }
0x2c7e   :  { %2120 = vsyncpa [#allocation7], 1 }
0x2c7f   :  { %2121 = vsyncpa [#allocation10], 1 }
0x2c80   :  { %2122 = vsyncpa [#allocation5], 1 }

</bundles_post_ra>
